<compile_context>
chip_gen: v6e
topology: v6e:2x2x1
jax: 0.10.0
libtpu: 0.0.40
codegen_flags: <defaults>
</compile_context>

<pallas_src>
import functools

import jax
import jax.numpy as jnp
from jax import lax
from jax.experimental import pallas as pl
from jax.experimental.pallas import tpu as pltpu


# ----------------------------- config (small) -----------------------------
BATCH = 2
SEQ = 8
HIDDEN = 64
NUM_HEADS = 4
HEAD_DIM = HIDDEN // NUM_HEADS          # 16
INTERMEDIATE = 128
NUM_LAYERS = 2
VOCAB = 256
PAD_TOKEN_ID = 0
MAX_POS = 64
RMS_EPS = 1e-6
MASK_VALUE = -1e30   # finite (avoids NaN if a row were ever fully masked)


# ----------------------------- kernel helpers -----------------------------
def _rms_norm(x, w, eps):
    # x: (rows, H) float32, w: (1, H) float32
    var = jnp.mean(x * x, axis=-1, keepdims=True)
    return (x * lax.rsqrt(var + eps)) * w


# ------------------------ fused whole-model kernel -------------------------
def llama_stack_kernel(x_ref, wqkv_ref, wo_ref, wgu_ref, wd_ref,
                       ln1_ref, ln2_ref, fnw_ref, cos_ref, sin_ref, rot_ref,
                       out_ref, *, eps, batch, seq, num_heads):
    h = x_ref[...]                               # (B*S, H) float32
    bs, hidden = h.shape
    assert bs == batch * seq
    num_layers = wqkv_ref.shape[0]
    inter = wd_ref.shape[1]
    head_dim = hidden // num_heads

    cos = cos_ref[...]                           # (B*S, H) f32 (tiled heads+batch)
    sin = sin_ref[...]                           # (B*S, H) f32
    rot = rot_ref[...]                           # (H, H)   f32 block-diag half-swap

    # Causal mask built ONCE, outside the per-layer loop.  (1, S, S)
    row = lax.broadcasted_iota(jnp.int32, (seq, seq), 0)
    col = lax.broadcasted_iota(jnp.int32, (seq, seq), 1)
    mask = jnp.where(col > row, MASK_VALUE, 0.0).astype(jnp.float32)[None]

    for li in range(num_layers):                 # static unroll; weights resident
        # ---- input RMSNorm (f32) ----
        hn = _rms_norm(h, ln1_ref[li], eps)

        # ---- fused lane-dense QKV projection: one (B*S,H)x(H,3H) MXU pass ----
        #      (Q columns pre-scaled by head_dim**-0.5 at weight-prep time)
        qkv = jnp.dot(hn.astype(jnp.bfloat16), wqkv_ref[li],
                      preferred_element_type=jnp.float32)        # (B*S, 3H)
        q2 = qkv[:, :hidden]
        k2 = qkv[:, hidden:2 * hidden]
        v2 = qkv[:, 2 * hidden:]

        # ---- RoPE (f32) on the lane-dense 2-D layout.  rotate_half is a
        #      per-head half-swap with sign, done as one tiny matmul. ----
        q2 = q2 * cos + jnp.dot(q2, rot, preferred_element_type=jnp.float32) * sin
        k2 = k2 * cos + jnp.dot(k2, rot, preferred_element_type=jnp.float32) * sin

        # ---- attention: (batch*head)-batched dot_generals, f32 throughout ----
        def to_heads(t2d):
            t = t2d.reshape(batch, seq, num_heads, head_dim)
            return jnp.swapaxes(t, 1, 2).reshape(batch * num_heads, seq, head_dim)

        q = to_heads(q2)
        k = to_heads(k2)
        v = to_heads(v2)
        s = jnp.einsum("bqd,bkd->bqk", q, k,
                       preferred_element_type=jnp.float32) + mask  # (B*NH,S,S)
        m = jnp.max(s, axis=-1, keepdims=True)
        p = jnp.exp(s - m)
        p = p / jnp.sum(p, axis=-1, keepdims=True)   # exact divide (was approx)
        o = jnp.einsum("bqk,bkd->bqd", p, v,
                       preferred_element_type=jnp.float32)         # (B*NH,S,hd)

        # ---- merge heads (head-major concat) + single 2-D output proj ----
        o = o.reshape(batch, num_heads, seq, head_dim)
        o2 = jnp.swapaxes(o, 1, 2).reshape(bs, hidden)              # (B*S, H)
        h = h + jnp.dot(o2.astype(jnp.bfloat16), wo_ref[li],
                        preferred_element_type=jnp.float32)

        # ---- post-attention RMSNorm + fused SwiGLU MLP + residual ----
        h2 = _rms_norm(h, ln2_ref[li], eps).astype(jnp.bfloat16)
        gu = jnp.dot(h2, wgu_ref[li], preferred_element_type=jnp.float32)  # (B*S,2I)
        g = gu[:, :inter]
        u = gu[:, inter:]
        act = (g * jax.nn.sigmoid(g) * u).astype(jnp.bfloat16)
        h = h + jnp.dot(act, wd_ref[li], preferred_element_type=jnp.float32)

    # ---- final RMSNorm fused into the same kernel ----
    out_ref[...] = _rms_norm(h, fnw_ref[...], eps)


def run_llama_stack(x2d, kp):
    bs, hidden = x2d.shape
    kernel = functools.partial(llama_stack_kernel, eps=RMS_EPS,
                               batch=BATCH, seq=SEQ, num_heads=NUM_HEADS)
    vmem = pl.BlockSpec(memory_space=pltpu.MemorySpace.VMEM)   # whole array in VMEM
    return pl.pallas_call(
        kernel,
        out_shape=jax.ShapeDtypeStruct((bs, hidden), jnp.float32),
        in_specs=[vmem] * 11,
        out_specs=vmem,
    )(x2d, kp["wqkv"], kp["wo"], kp["wgu"], kp["wd"],
      kp["ln1"], kp["ln2"], kp["final_norm"], kp["cos"], kp["sin"], kp["rot"])


# ----------------------------- parameter init -----------------------------
def init_base_params(key):
    keys = jax.random.split(key, 1 + NUM_LAYERS * 7)
    scale = 0.02

    def w(k, shape):
        return (scale * jax.random.normal(k, shape, jnp.float32)).astype(jnp.bfloat16)

    embed = scale * jax.random.normal(keys[0], (VOCAB, HIDDEN), jnp.float32)
    embed = embed.at[PAD_TOKEN_ID].set(0.0)   # nn.Embedding zeroes padding_idx row

    layers = []
    for li in range(NUM_LAYERS):
        k = keys[1 + li * 7: 1 + (li + 1) * 7]
        layers.append({
            # stored pre-transposed: (in, out) so that y = x @ W (== x @ weight.T)
            "wq": w(k[0], (HIDDEN, HIDDEN)),
            "wk": w(k[1], (HIDDEN, HIDDEN)),
            "wv": w(k[2], (HIDDEN, HIDDEN)),
            "wo": w(k[3], (HIDDEN, HIDDEN)),
            "wg": w(k[4], (HIDDEN, INTERMEDIATE)),
            "wu": w(k[5], (HIDDEN, INTERMEDIATE)),
            "wd": w(k[6], (INTERMEDIATE, HIDDEN)),
            "ln1": jnp.ones((1, HIDDEN), jnp.float32),
            "ln2": jnp.ones((1, HIDDEN), jnp.float32),
        })
    final_norm = jnp.ones((1, HIDDEN), jnp.float32)
    return {"embed": embed, "layers": layers, "final_norm": final_norm}


def rotary_tables(seq_len, dim):
    inv_freq = 1.0 / (10000.0 ** (jnp.arange(0, dim, 2, dtype=jnp.float32) / dim))
    t = jnp.arange(MAX_POS, dtype=jnp.float32)
    freqs = jnp.einsum("i,j->ij", t, inv_freq)
    emb = jnp.concatenate((freqs, freqs), axis=-1)           # (MAX_POS, dim)
    return jnp.cos(emb)[:seq_len], jnp.sin(emb)[:seq_len]


def prepare_kernel_params(base, batch, seq):
    """Stack per-layer weights, fuse QKV / gate-up into lane-dense 2-D weights,
    fold the attention scaling into Wq (exact: 0.25 is a power of two), build
    the rotate_half permutation matrix and the tiled cos/sin tables.  All done
    once in plain XLA -- free at run time."""
    nh, hd = NUM_HEADS, HEAD_DIM
    scaling = hd ** (-0.5)   # 0.25 -> exact in bf16, folding is lossless

    wqkv, wo, wgu, wd, ln1, ln2 = [], [], [], [], [], []
    for lp in base["layers"]:
        wqkv.append(jnp.concatenate(
            [lp["wq"] * scaling, lp["wk"], lp["wv"]], axis=1))       # (H, 3H)
        wo.append(lp["wo"])                                          # (H, H)
        wgu.append(jnp.concatenate([lp["wg"], lp["wu"]], axis=1))    # (H, 2I)
        wd.append(lp["wd"])                                          # (I, H)
        ln1.append(lp["ln1"])
        ln2.append(lp["ln2"])

    # rotate_half(x) == x @ rot  with rot a block-diagonal +/-1 half-swap
    # (one (hd x hd) block per head, head-major column layout).
    half = hd // 2
    blk = jnp.zeros((hd, hd), jnp.float32)
    blk = blk.at[half:, :half].set(-jnp.eye(half, dtype=jnp.float32))
    blk = blk.at[:half, half:].set(jnp.eye(half, dtype=jnp.float32))
    rot = jnp.kron(jnp.eye(nh, dtype=jnp.float32), blk)              # (H, H)

    # cos/sin tiled across heads (columns) and batch (rows): (B*S, H)
    cos, sin = rotary_tables(seq, hd)
    cos_full = jnp.tile(jnp.tile(cos, (1, nh)), (batch, 1))
    sin_full = jnp.tile(jnp.tile(sin, (1, nh)), (batch, 1))

    return {
        "wqkv": jnp.stack(wqkv),            # (L, H, 3H)  bf16 (Q pre-scaled)
        "wo": jnp.stack(wo),                # (L, H, H)   bf16
        "wgu": jnp.stack(wgu),              # (L, H, 2I)  bf16
        "wd": jnp.stack(wd),                # (L, I, H)   bf16
        "ln1": jnp.stack(ln1),              # (L, 1, H)   f32
        "ln2": jnp.stack(ln2),              # (L, 1, H)   f32
        "final_norm": base["final_norm"],   # (1, H)      f32
        "rot": rot,                         # (H, H)      f32
        "cos": cos_full,                    # (B*S, H)    f32
        "sin": sin_full,                    # (B*S, H)    f32
    }


# ----------------------------- full model forward -----------------------------
@jax.jit
def llama_model_forward(input_ids, embed, kernel_params):
    b, s = input_ids.shape
    hidden = jnp.take(embed, input_ids, axis=0)              # (B, S, H) f32
    out2d = run_llama_stack(hidden.reshape(b * s, HIDDEN), kernel_params)
    return out2d.reshape(b, s, HIDDEN)


# ----------------------------- pure-JAX reference -----------------------------
def _ref_rms(x, w, eps):
    var = jnp.mean(x * x, axis=-1, keepdims=True)
    return x * lax.rsqrt(var + eps) * w[0]


def _ref_rotate_half(x):
    half = x.shape[-1] // 2
    return jnp.concatenate((-x[..., half:], x[..., :half]), axis=-1)


def reference_forward(input_ids, base, cos, sin):
    x = jnp.take(base["embed"], input_ids, axis=0)           # (B, S, H) f32
    B, S, H = x.shape
    nh, hd = NUM_HEADS, HEAD_DIM
    scaling = hd ** (-0.5)
    row = jnp.arange(S)[:, None]
    col = jnp.arange(S)[None, :]
    mask = jnp.where(col > row, MASK_VALUE, 0.0).astype(jnp.float32)

    def mm(a, b):  # bf16 x bf16 matmul with f32 accumulation (mirrors kernel proj/MLP)
        return jnp.einsum("...ij,jk->...ik", a.astype(jnp.bfloat16), b,
                          preferred_element_type=jnp.float32)

    hi = jax.lax.Precision.HIGHEST   # keep f32 attention matmuls truly f32

    for lp in base["layers"]:
        hn = _ref_rms(x, lp["ln1"], RMS_EPS)
        q = mm(hn, lp["wq"]) * scaling
        k = mm(hn, lp["wk"])
        v = mm(hn, lp["wv"])
        q = q.reshape(B, S, nh, hd).transpose(0, 2, 1, 3)
        k = k.reshape(B, S, nh, hd).transpose(0, 2, 1, 3)
        v = v.reshape(B, S, nh, hd).transpose(0, 2, 1, 3)
        q = q * cos + _ref_rotate_half(q) * sin
        k = k * cos + _ref_rotate_half(k) * sin
        s = jnp.einsum("bnqd,bnkd->bnqk", q, k,
                       preferred_element_type=jnp.float32, precision=hi) + mask
        p = jax.nn.softmax(s, axis=-1)
        o = jnp.einsum("bnqk,bnkd->bnqd", p, v,
                       preferred_element_type=jnp.float32, precision=hi)
        o = o.transpose(0, 2, 1, 3).reshape(B, S, H)
        x = x + mm(o, lp["wo"])
        h2 = _ref_rms(x, lp["ln2"], RMS_EPS)
        g = mm(h2, lp["wg"])
        u = mm(h2, lp["wu"])
        x = x + mm(g * jax.nn.sigmoid(g) * u, lp["wd"])
    return _ref_rms(x, base["final_norm"], RMS_EPS)


# ----------------------------- main -----------------------------
if __name__ == "__main__":
    key = jax.random.PRNGKey(0)
    pkey, ikey = jax.random.split(key)

    base = init_base_params(pkey)
    kernel_params = prepare_kernel_params(base, BATCH, SEQ)
    input_ids = jax.random.randint(ikey, (BATCH, SEQ), 0, VOCAB, dtype=jnp.int32)

    out = llama_model_forward(input_ids, base["embed"], kernel_params)
    out = jax.block_until_ready(out)
    assert out.shape == (BATCH, SEQ, HIDDEN)

    cos, sin = rotary_tables(SEQ, HEAD_DIM)
    ref = reference_forward(input_ids, base, cos, sin)
    max_err = float(jnp.max(jnp.abs(out - ref)))
    assert jnp.allclose(out, ref, atol=5e-3, rtol=5e-3), f"max abs diff {max_err}"

    print("KERNEL_OK")
</pallas_src>

<mosaic_0001>
module attributes {stable_mosaic.version = 11 : i64} {
  func.func @llama_stack_kernel(%arg0: memref<16x64xf32, #tpu.memory_space<vmem>>, %arg1: memref<2x64x192xbf16, #tpu.memory_space<vmem>>, %arg2: memref<2x64x64xbf16, #tpu.memory_space<vmem>>, %arg3: memref<2x64x256xbf16, #tpu.memory_space<vmem>>, %arg4: memref<2x128x64xbf16, #tpu.memory_space<vmem>>, %arg5: memref<2x1x64xf32, #tpu.memory_space<vmem>>, %arg6: memref<2x1x64xf32, #tpu.memory_space<vmem>>, %arg7: memref<1x64xf32, #tpu.memory_space<vmem>>, %arg8: memref<16x64xf32, #tpu.memory_space<vmem>>, %arg9: memref<16x64xf32, #tpu.memory_space<vmem>>, %arg10: memref<64x64xf32, #tpu.memory_space<vmem>>, %arg11: memref<16x64xf32, #tpu.memory_space<vmem>>) attributes {dimension_semantics = [], scalar_prefetch = 0 : i64, scratch_operands = 0 : i64, tpu.core_type = #tpu.core_type<tc>} {
    %c0 = arith.constant 0 : index
    %c0_0 = arith.constant 0 : index
    %0 = vector.load %arg0[%c0, %c0_0] : memref<16x64xf32, #tpu.memory_space<vmem>>, vector<16x64xf32>
    %c0_1 = arith.constant 0 : index
    %c0_2 = arith.constant 0 : index
    %1 = vector.load %arg8[%c0_1, %c0_2] : memref<16x64xf32, #tpu.memory_space<vmem>>, vector<16x64xf32>
    %c0_3 = arith.constant 0 : index
    %c0_4 = arith.constant 0 : index
    %2 = vector.load %arg9[%c0_3, %c0_4] : memref<16x64xf32, #tpu.memory_space<vmem>>, vector<16x64xf32>
    %c0_5 = arith.constant 0 : index
    %c0_6 = arith.constant 0 : index
    %3 = vector.load %arg10[%c0_5, %c0_6] : memref<64x64xf32, #tpu.memory_space<vmem>>, vector<64x64xf32>
    %4 = tpu.iota {dimensions = array<i32: 0>} : vector<8x8xi32>
    %5 = tpu.iota {dimensions = array<i32: 1>} : vector<8x8xi32>
    %6 = arith.cmpi sgt, %5, %4 : vector<8x8xi32>
    %cst = arith.constant -1.000000e+30 : f32
    %cst_7 = arith.constant 0.000000e+00 : f32
    %7 = vector.broadcast %cst : f32 to vector<8x8xf32>
    %8 = vector.broadcast %cst_7 : f32 to vector<8x8xf32>
    %9 = arith.select %6, %7, %8 : vector<8x8xi1>, vector<8x8xf32>
    %10 = vector.shape_cast %9 : vector<8x8xf32> to vector<1x8x8xf32>
    %c0_8 = arith.constant 0 : index
    %c0_9 = arith.constant 0 : index
    %c0_10 = arith.constant 0 : index
    %11 = vector.load %arg5[%c0_8, %c0_9, %c0_10] : memref<2x1x64xf32, #tpu.memory_space<vmem>>, vector<1x1x64xf32>
    %12 = vector.shape_cast %11 : vector<1x1x64xf32> to vector<1x64xf32>
    %13 = arith.mulf %0, %0 : vector<16x64xf32>
    %cst_11 = arith.constant dense<0.000000e+00> : vector<16xf32>
    %14 = vector.multi_reduction <add>, %13, %cst_11 [1] : vector<16x64xf32> to vector<16xf32>
    %15 = vector.shape_cast %14 : vector<16xf32> to vector<16x1xf32>
    %cst_12 = arith.constant 6.400000e+01 : f32
    %16 = vector.broadcast %cst_12 : f32 to vector<16x1xf32>
    %17 = arith.divf %15, %16 : vector<16x1xf32>
    %cst_13 = arith.constant 9.99999997E-7 : f32
    %18 = vector.broadcast %cst_13 : f32 to vector<16x1xf32>
    %19 = arith.addf %17, %18 : vector<16x1xf32>
    %20 = math.rsqrt %19 : vector<16x1xf32>
    %21 = vector.broadcast %20 : vector<16x1xf32> to vector<16x64xf32>
    %22 = arith.mulf %0, %21 : vector<16x64xf32>
    %23 = vector.broadcast %12 : vector<1x64xf32> to vector<16x64xf32>
    %24 = arith.mulf %22, %23 : vector<16x64xf32>
    %25 = arith.truncf %24 : vector<16x64xf32> to vector<16x64xbf16>
    %c0_14 = arith.constant 0 : index
    %c0_15 = arith.constant 0 : index
    %c0_16 = arith.constant 0 : index
    %26 = vector.load %arg1[%c0_14, %c0_15, %c0_16] : memref<2x64x192xbf16, #tpu.memory_space<vmem>>, vector<1x64x192xbf16>
    %27 = vector.shape_cast %26 : vector<1x64x192xbf16> to vector<64x192xbf16>
    %cst_17 = arith.constant dense<0.000000e+00> : vector<16x192xf32>
    %28 = tpu.matmul %25, %27, %cst_17 {dimension_numbers = #tpu.dot_dimension_numbers<[1], [0], [0], [1], [0, 0, 1, 1], [], []>} : vector<16x64xbf16>, vector<64x192xbf16>, vector<16x192xf32> -> vector<16x192xf32>
    %29 = vector.extract_strided_slice %28 {offsets = [0, 0], sizes = [16, 64], strides = [1, 1]} : vector<16x192xf32> to vector<16x64xf32>
    %30 = vector.extract_strided_slice %28 {offsets = [0, 64], sizes = [16, 64], strides = [1, 1]} : vector<16x192xf32> to vector<16x64xf32>
    %31 = vector.extract_strided_slice %28 {offsets = [0, 128], sizes = [16, 64], strides = [1, 1]} : vector<16x192xf32> to vector<16x64xf32>
    %32 = arith.mulf %29, %1 : vector<16x64xf32>
    %cst_18 = arith.constant dense<0.000000e+00> : vector<16x64xf32>
    %33 = tpu.matmul %29, %3, %cst_18 {dimension_numbers = #tpu.dot_dimension_numbers<[1], [0], [0], [1], [0, 0, 1, 1], [], []>} : vector<16x64xf32>, vector<64x64xf32>, vector<16x64xf32> -> vector<16x64xf32>
    %34 = arith.mulf %33, %2 : vector<16x64xf32>
    %35 = arith.addf %32, %34 : vector<16x64xf32>
    %36 = arith.mulf %30, %1 : vector<16x64xf32>
    %cst_19 = arith.constant dense<0.000000e+00> : vector<16x64xf32>
    %37 = tpu.matmul %30, %3, %cst_19 {dimension_numbers = #tpu.dot_dimension_numbers<[1], [0], [0], [1], [0, 0, 1, 1], [], []>} : vector<16x64xf32>, vector<64x64xf32>, vector<16x64xf32> -> vector<16x64xf32>
    %38 = arith.mulf %37, %2 : vector<16x64xf32>
    %39 = arith.addf %36, %38 : vector<16x64xf32>
    %40 = vector.shape_cast %35 : vector<16x64xf32> to vector<2x8x4x16xf32>
    %41 = tpu.transpose %40, [0, 2, 1, 3] : vector<2x8x4x16xf32> -> vector<2x4x8x16xf32>
    %42 = vector.shape_cast %41 : vector<2x4x8x16xf32> to vector<8x8x16xf32>
    %43 = vector.shape_cast %39 : vector<16x64xf32> to vector<2x8x4x16xf32>
    %44 = tpu.transpose %43, [0, 2, 1, 3] : vector<2x8x4x16xf32> -> vector<2x4x8x16xf32>
    %45 = vector.shape_cast %44 : vector<2x4x8x16xf32> to vector<8x8x16xf32>
    %46 = vector.shape_cast %31 : vector<16x64xf32> to vector<2x8x4x16xf32>
    %47 = tpu.transpose %46, [0, 2, 1, 3] : vector<2x8x4x16xf32> -> vector<2x4x8x16xf32>
    %48 = vector.shape_cast %47 : vector<2x4x8x16xf32> to vector<8x8x16xf32>
    "tpu.trace_start"() <{level = 10 : i32, message = "bqd,bkd->bqk"}> : () -> ()
    %cst_20 = arith.constant dense<0.000000e+00> : vector<8x8x8xf32>
    %49 = tpu.matmul %42, %45, %cst_20 {dimension_numbers = #tpu.dot_dimension_numbers<[2], [2], [1], [1], [0, 0, 0, 1, 1, 1], [0], [0]>} : vector<8x8x16xf32>, vector<8x8x16xf32>, vector<8x8x8xf32> -> vector<8x8x8xf32>
    "tpu.trace_stop"() : () -> ()
    %50 = vector.broadcast %10 : vector<1x8x8xf32> to vector<8x8x8xf32>
    %51 = arith.addf %49, %50 : vector<8x8x8xf32>
    %cst_21 = arith.constant dense<0xFF800000> : vector<8x8xf32>
    %52 = vector.multi_reduction <maximumf>, %51, %cst_21 [2] : vector<8x8x8xf32> to vector<8x8xf32>
    %53 = vector.shape_cast %52 : vector<8x8xf32> to vector<8x8x1xf32>
    %54 = vector.broadcast %53 : vector<8x8x1xf32> to vector<8x8x8xf32>
    %55 = arith.subf %51, %54 : vector<8x8x8xf32>
    %56 = math.exp %55 : vector<8x8x8xf32>
    %cst_22 = arith.constant dense<0.000000e+00> : vector<8x8xf32>
    %57 = vector.multi_reduction <add>, %56, %cst_22 [2] : vector<8x8x8xf32> to vector<8x8xf32>
    %58 = vector.shape_cast %57 : vector<8x8xf32> to vector<8x8x1xf32>
    %59 = vector.broadcast %58 : vector<8x8x1xf32> to vector<8x8x8xf32>
    %60 = arith.divf %56, %59 : vector<8x8x8xf32>
    "tpu.trace_start"() <{level = 10 : i32, message = "bqk,bkd->bqd"}> : () -> ()
    %cst_23 = arith.constant dense<0.000000e+00> : vector<8x8x16xf32>
    %61 = tpu.matmul %60, %48, %cst_23 {dimension_numbers = #tpu.dot_dimension_numbers<[2], [1], [1], [2], [0, 0, 0, 1, 1, 2], [0], [0]>} : vector<8x8x8xf32>, vector<8x8x16xf32>, vector<8x8x16xf32> -> vector<8x8x16xf32>
    "tpu.trace_stop"() : () -> ()
    %62 = vector.shape_cast %61 : vector<8x8x16xf32> to vector<2x4x8x16xf32>
    %63 = tpu.transpose %62, [0, 2, 1, 3] : vector<2x4x8x16xf32> -> vector<2x8x4x16xf32>
    %64 = vector.shape_cast %63 : vector<2x8x4x16xf32> to vector<16x64xf32>
    %65 = arith.truncf %64 : vector<16x64xf32> to vector<16x64xbf16>
    %c0_24 = arith.constant 0 : index
    %c0_25 = arith.constant 0 : index
    %c0_26 = arith.constant 0 : index
    %66 = vector.load %arg2[%c0_24, %c0_25, %c0_26] : memref<2x64x64xbf16, #tpu.memory_space<vmem>>, vector<1x64x64xbf16>
    %67 = vector.shape_cast %66 : vector<1x64x64xbf16> to vector<64x64xbf16>
    %cst_27 = arith.constant dense<0.000000e+00> : vector<16x64xf32>
    %68 = tpu.matmul %65, %67, %cst_27 {dimension_numbers = #tpu.dot_dimension_numbers<[1], [0], [0], [1], [0, 0, 1, 1], [], []>} : vector<16x64xbf16>, vector<64x64xbf16>, vector<16x64xf32> -> vector<16x64xf32>
    %69 = arith.addf %0, %68 : vector<16x64xf32>
    %c0_28 = arith.constant 0 : index
    %c0_29 = arith.constant 0 : index
    %c0_30 = arith.constant 0 : index
    %70 = vector.load %arg6[%c0_28, %c0_29, %c0_30] : memref<2x1x64xf32, #tpu.memory_space<vmem>>, vector<1x1x64xf32>
    %71 = vector.shape_cast %70 : vector<1x1x64xf32> to vector<1x64xf32>
    %72 = arith.mulf %69, %69 : vector<16x64xf32>
    %cst_31 = arith.constant dense<0.000000e+00> : vector<16xf32>
    %73 = vector.multi_reduction <add>, %72, %cst_31 [1] : vector<16x64xf32> to vector<16xf32>
    %74 = vector.shape_cast %73 : vector<16xf32> to vector<16x1xf32>
    %cst_32 = arith.constant 6.400000e+01 : f32
    %75 = vector.broadcast %cst_32 : f32 to vector<16x1xf32>
    %76 = arith.divf %74, %75 : vector<16x1xf32>
    %cst_33 = arith.constant 9.99999997E-7 : f32
    %77 = vector.broadcast %cst_33 : f32 to vector<16x1xf32>
    %78 = arith.addf %76, %77 : vector<16x1xf32>
    %79 = math.rsqrt %78 : vector<16x1xf32>
    %80 = vector.broadcast %79 : vector<16x1xf32> to vector<16x64xf32>
    %81 = arith.mulf %69, %80 : vector<16x64xf32>
    %82 = vector.broadcast %71 : vector<1x64xf32> to vector<16x64xf32>
    %83 = arith.mulf %81, %82 : vector<16x64xf32>
    %84 = arith.truncf %83 : vector<16x64xf32> to vector<16x64xbf16>
    %c0_34 = arith.constant 0 : index
    %c0_35 = arith.constant 0 : index
    %c0_36 = arith.constant 0 : index
    %85 = vector.load %arg3[%c0_34, %c0_35, %c0_36] : memref<2x64x256xbf16, #tpu.memory_space<vmem>>, vector<1x64x256xbf16>
    %86 = vector.shape_cast %85 : vector<1x64x256xbf16> to vector<64x256xbf16>
    %cst_37 = arith.constant dense<0.000000e+00> : vector<16x256xf32>
    %87 = tpu.matmul %84, %86, %cst_37 {dimension_numbers = #tpu.dot_dimension_numbers<[1], [0], [0], [1], [0, 0, 1, 1], [], []>} : vector<16x64xbf16>, vector<64x256xbf16>, vector<16x256xf32> -> vector<16x256xf32>
    %88 = vector.extract_strided_slice %87 {offsets = [0, 0], sizes = [16, 128], strides = [1, 1]} : vector<16x256xf32> to vector<16x128xf32>
    %89 = vector.extract_strided_slice %87 {offsets = [0, 128], sizes = [16, 128], strides = [1, 1]} : vector<16x256xf32> to vector<16x128xf32>
    %90 = arith.negf %88 : vector<16x128xf32>
    %91 = math.exp %90 : vector<16x128xf32>
    %cst_38 = arith.constant 1.000000e+00 : f32
    %92 = vector.broadcast %cst_38 : f32 to vector<16x128xf32>
    %93 = arith.addf %92, %91 : vector<16x128xf32>
    %94 = arith.divf %92, %93 : vector<16x128xf32>
    %95 = arith.mulf %88, %94 : vector<16x128xf32>
    %96 = arith.mulf %95, %89 : vector<16x128xf32>
    %97 = arith.truncf %96 : vector<16x128xf32> to vector<16x128xbf16>
    %c0_39 = arith.constant 0 : index
    %c0_40 = arith.constant 0 : index
    %c0_41 = arith.constant 0 : index
    %98 = vector.load %arg4[%c0_39, %c0_40, %c0_41] : memref<2x128x64xbf16, #tpu.memory_space<vmem>>, vector<1x128x64xbf16>
    %99 = vector.shape_cast %98 : vector<1x128x64xbf16> to vector<128x64xbf16>
    %cst_42 = arith.constant dense<0.000000e+00> : vector<16x64xf32>
    %100 = tpu.matmul %97, %99, %cst_42 {dimension_numbers = #tpu.dot_dimension_numbers<[1], [0], [0], [1], [0, 0, 1, 1], [], []>} : vector<16x128xbf16>, vector<128x64xbf16>, vector<16x64xf32> -> vector<16x64xf32>
    %101 = arith.addf %69, %100 : vector<16x64xf32>
    %c1 = arith.constant 1 : index
    %c0_43 = arith.constant 0 : index
    %c0_44 = arith.constant 0 : index
    %102 = vector.load %arg5[%c1, %c0_43, %c0_44] : memref<2x1x64xf32, #tpu.memory_space<vmem>>, vector<1x1x64xf32>
    %103 = vector.shape_cast %102 : vector<1x1x64xf32> to vector<1x64xf32>
    %104 = arith.mulf %101, %101 : vector<16x64xf32>
    %cst_45 = arith.constant dense<0.000000e+00> : vector<16xf32>
    %105 = vector.multi_reduction <add>, %104, %cst_45 [1] : vector<16x64xf32> to vector<16xf32>
    %106 = vector.shape_cast %105 : vector<16xf32> to vector<16x1xf32>
    %cst_46 = arith.constant 6.400000e+01 : f32
    %107 = vector.broadcast %cst_46 : f32 to vector<16x1xf32>
    %108 = arith.divf %106, %107 : vector<16x1xf32>
    %cst_47 = arith.constant 9.99999997E-7 : f32
    %109 = vector.broadcast %cst_47 : f32 to vector<16x1xf32>
    %110 = arith.addf %108, %109 : vector<16x1xf32>
    %111 = math.rsqrt %110 : vector<16x1xf32>
    %112 = vector.broadcast %111 : vector<16x1xf32> to vector<16x64xf32>
    %113 = arith.mulf %101, %112 : vector<16x64xf32>
    %114 = vector.broadcast %103 : vector<1x64xf32> to vector<16x64xf32>
    %115 = arith.mulf %113, %114 : vector<16x64xf32>
    %116 = arith.truncf %115 : vector<16x64xf32> to vector<16x64xbf16>
    %c1_48 = arith.constant 1 : index
    %c0_49 = arith.constant 0 : index
    %c0_50 = arith.constant 0 : index
    %117 = vector.load %arg1[%c1_48, %c0_49, %c0_50] : memref<2x64x192xbf16, #tpu.memory_space<vmem>>, vector<1x64x192xbf16>
    %118 = vector.shape_cast %117 : vector<1x64x192xbf16> to vector<64x192xbf16>
    %cst_51 = arith.constant dense<0.000000e+00> : vector<16x192xf32>
    %119 = tpu.matmul %116, %118, %cst_51 {dimension_numbers = #tpu.dot_dimension_numbers<[1], [0], [0], [1], [0, 0, 1, 1], [], []>} : vector<16x64xbf16>, vector<64x192xbf16>, vector<16x192xf32> -> vector<16x192xf32>
    %120 = vector.extract_strided_slice %119 {offsets = [0, 0], sizes = [16, 64], strides = [1, 1]} : vector<16x192xf32> to vector<16x64xf32>
    %121 = vector.extract_strided_slice %119 {offsets = [0, 64], sizes = [16, 64], strides = [1, 1]} : vector<16x192xf32> to vector<16x64xf32>
    %122 = vector.extract_strided_slice %119 {offsets = [0, 128], sizes = [16, 64], strides = [1, 1]} : vector<16x192xf32> to vector<16x64xf32>
    %123 = arith.mulf %120, %1 : vector<16x64xf32>
    %cst_52 = arith.constant dense<0.000000e+00> : vector<16x64xf32>
    %124 = tpu.matmul %120, %3, %cst_52 {dimension_numbers = #tpu.dot_dimension_numbers<[1], [0], [0], [1], [0, 0, 1, 1], [], []>} : vector<16x64xf32>, vector<64x64xf32>, vector<16x64xf32> -> vector<16x64xf32>
    %125 = arith.mulf %124, %2 : vector<16x64xf32>
    %126 = arith.addf %123, %125 : vector<16x64xf32>
    %127 = arith.mulf %121, %1 : vector<16x64xf32>
    %cst_53 = arith.constant dense<0.000000e+00> : vector<16x64xf32>
    %128 = tpu.matmul %121, %3, %cst_53 {dimension_numbers = #tpu.dot_dimension_numbers<[1], [0], [0], [1], [0, 0, 1, 1], [], []>} : vector<16x64xf32>, vector<64x64xf32>, vector<16x64xf32> -> vector<16x64xf32>
    %129 = arith.mulf %128, %2 : vector<16x64xf32>
    %130 = arith.addf %127, %129 : vector<16x64xf32>
    %131 = vector.shape_cast %126 : vector<16x64xf32> to vector<2x8x4x16xf32>
    %132 = tpu.transpose %131, [0, 2, 1, 3] : vector<2x8x4x16xf32> -> vector<2x4x8x16xf32>
    %133 = vector.shape_cast %132 : vector<2x4x8x16xf32> to vector<8x8x16xf32>
    %134 = vector.shape_cast %130 : vector<16x64xf32> to vector<2x8x4x16xf32>
    %135 = tpu.transpose %134, [0, 2, 1, 3] : vector<2x8x4x16xf32> -> vector<2x4x8x16xf32>
    %136 = vector.shape_cast %135 : vector<2x4x8x16xf32> to vector<8x8x16xf32>
    %137 = vector.shape_cast %122 : vector<16x64xf32> to vector<2x8x4x16xf32>
    %138 = tpu.transpose %137, [0, 2, 1, 3] : vector<2x8x4x16xf32> -> vector<2x4x8x16xf32>
    %139 = vector.shape_cast %138 : vector<2x4x8x16xf32> to vector<8x8x16xf32>
    "tpu.trace_start"() <{level = 10 : i32, message = "bqd,bkd->bqk"}> : () -> ()
    %cst_54 = arith.constant dense<0.000000e+00> : vector<8x8x8xf32>
    %140 = tpu.matmul %133, %136, %cst_54 {dimension_numbers = #tpu.dot_dimension_numbers<[2], [2], [1], [1], [0, 0, 0, 1, 1, 1], [0], [0]>} : vector<8x8x16xf32>, vector<8x8x16xf32>, vector<8x8x8xf32> -> vector<8x8x8xf32>
    "tpu.trace_stop"() : () -> ()
    %141 = vector.broadcast %10 : vector<1x8x8xf32> to vector<8x8x8xf32>
    %142 = arith.addf %140, %141 : vector<8x8x8xf32>
    %cst_55 = arith.constant dense<0xFF800000> : vector<8x8xf32>
    %143 = vector.multi_reduction <maximumf>, %142, %cst_55 [2] : vector<8x8x8xf32> to vector<8x8xf32>
    %144 = vector.shape_cast %143 : vector<8x8xf32> to vector<8x8x1xf32>
    %145 = vector.broadcast %144 : vector<8x8x1xf32> to vector<8x8x8xf32>
    %146 = arith.subf %142, %145 : vector<8x8x8xf32>
    %147 = math.exp %146 : vector<8x8x8xf32>
    %cst_56 = arith.constant dense<0.000000e+00> : vector<8x8xf32>
    %148 = vector.multi_reduction <add>, %147, %cst_56 [2] : vector<8x8x8xf32> to vector<8x8xf32>
    %149 = vector.shape_cast %148 : vector<8x8xf32> to vector<8x8x1xf32>
    %150 = vector.broadcast %149 : vector<8x8x1xf32> to vector<8x8x8xf32>
    %151 = arith.divf %147, %150 : vector<8x8x8xf32>
    "tpu.trace_start"() <{level = 10 : i32, message = "bqk,bkd->bqd"}> : () -> ()
    %cst_57 = arith.constant dense<0.000000e+00> : vector<8x8x16xf32>
    %152 = tpu.matmul %151, %139, %cst_57 {dimension_numbers = #tpu.dot_dimension_numbers<[2], [1], [1], [2], [0, 0, 0, 1, 1, 2], [0], [0]>} : vector<8x8x8xf32>, vector<8x8x16xf32>, vector<8x8x16xf32> -> vector<8x8x16xf32>
    "tpu.trace_stop"() : () -> ()
    %153 = vector.shape_cast %152 : vector<8x8x16xf32> to vector<2x4x8x16xf32>
    %154 = tpu.transpose %153, [0, 2, 1, 3] : vector<2x4x8x16xf32> -> vector<2x8x4x16xf32>
    %155 = vector.shape_cast %154 : vector<2x8x4x16xf32> to vector<16x64xf32>
    %156 = arith.truncf %155 : vector<16x64xf32> to vector<16x64xbf16>
    %c1_58 = arith.constant 1 : index
    %c0_59 = arith.constant 0 : index
    %c0_60 = arith.constant 0 : index
    %157 = vector.load %arg2[%c1_58, %c0_59, %c0_60] : memref<2x64x64xbf16, #tpu.memory_space<vmem>>, vector<1x64x64xbf16>
    %158 = vector.shape_cast %157 : vector<1x64x64xbf16> to vector<64x64xbf16>
    %cst_61 = arith.constant dense<0.000000e+00> : vector<16x64xf32>
    %159 = tpu.matmul %156, %158, %cst_61 {dimension_numbers = #tpu.dot_dimension_numbers<[1], [0], [0], [1], [0, 0, 1, 1], [], []>} : vector<16x64xbf16>, vector<64x64xbf16>, vector<16x64xf32> -> vector<16x64xf32>
    %160 = arith.addf %101, %159 : vector<16x64xf32>
    %c1_62 = arith.constant 1 : index
    %c0_63 = arith.constant 0 : index
    %c0_64 = arith.constant 0 : index
    %161 = vector.load %arg6[%c1_62, %c0_63, %c0_64] : memref<2x1x64xf32, #tpu.memory_space<vmem>>, vector<1x1x64xf32>
    %162 = vector.shape_cast %161 : vector<1x1x64xf32> to vector<1x64xf32>
    %163 = arith.mulf %160, %160 : vector<16x64xf32>
    %cst_65 = arith.constant dense<0.000000e+00> : vector<16xf32>
    %164 = vector.multi_reduction <add>, %163, %cst_65 [1] : vector<16x64xf32> to vector<16xf32>
    %165 = vector.shape_cast %164 : vector<16xf32> to vector<16x1xf32>
    %cst_66 = arith.constant 6.400000e+01 : f32
    %166 = vector.broadcast %cst_66 : f32 to vector<16x1xf32>
    %167 = arith.divf %165, %166 : vector<16x1xf32>
    %cst_67 = arith.constant 9.99999997E-7 : f32
    %168 = vector.broadcast %cst_67 : f32 to vector<16x1xf32>
    %169 = arith.addf %167, %168 : vector<16x1xf32>
    %170 = math.rsqrt %169 : vector<16x1xf32>
    %171 = vector.broadcast %170 : vector<16x1xf32> to vector<16x64xf32>
    %172 = arith.mulf %160, %171 : vector<16x64xf32>
    %173 = vector.broadcast %162 : vector<1x64xf32> to vector<16x64xf32>
    %174 = arith.mulf %172, %173 : vector<16x64xf32>
    %175 = arith.truncf %174 : vector<16x64xf32> to vector<16x64xbf16>
    %c1_68 = arith.constant 1 : index
    %c0_69 = arith.constant 0 : index
    %c0_70 = arith.constant 0 : index
    %176 = vector.load %arg3[%c1_68, %c0_69, %c0_70] : memref<2x64x256xbf16, #tpu.memory_space<vmem>>, vector<1x64x256xbf16>
    %177 = vector.shape_cast %176 : vector<1x64x256xbf16> to vector<64x256xbf16>
    %cst_71 = arith.constant dense<0.000000e+00> : vector<16x256xf32>
    %178 = tpu.matmul %175, %177, %cst_71 {dimension_numbers = #tpu.dot_dimension_numbers<[1], [0], [0], [1], [0, 0, 1, 1], [], []>} : vector<16x64xbf16>, vector<64x256xbf16>, vector<16x256xf32> -> vector<16x256xf32>
    %179 = vector.extract_strided_slice %178 {offsets = [0, 0], sizes = [16, 128], strides = [1, 1]} : vector<16x256xf32> to vector<16x128xf32>
    %180 = vector.extract_strided_slice %178 {offsets = [0, 128], sizes = [16, 128], strides = [1, 1]} : vector<16x256xf32> to vector<16x128xf32>
    %181 = arith.negf %179 : vector<16x128xf32>
    %182 = math.exp %181 : vector<16x128xf32>
    %cst_72 = arith.constant 1.000000e+00 : f32
    %183 = vector.broadcast %cst_72 : f32 to vector<16x128xf32>
    %184 = arith.addf %183, %182 : vector<16x128xf32>
    %185 = arith.divf %183, %184 : vector<16x128xf32>
    %186 = arith.mulf %179, %185 : vector<16x128xf32>
    %187 = arith.mulf %186, %180 : vector<16x128xf32>
    %188 = arith.truncf %187 : vector<16x128xf32> to vector<16x128xbf16>
    %c1_73 = arith.constant 1 : index
    %c0_74 = arith.constant 0 : index
    %c0_75 = arith.constant 0 : index
    %189 = vector.load %arg4[%c1_73, %c0_74, %c0_75] : memref<2x128x64xbf16, #tpu.memory_space<vmem>>, vector<1x128x64xbf16>
    %190 = vector.shape_cast %189 : vector<1x128x64xbf16> to vector<128x64xbf16>
    %cst_76 = arith.constant dense<0.000000e+00> : vector<16x64xf32>
    %191 = tpu.matmul %188, %190, %cst_76 {dimension_numbers = #tpu.dot_dimension_numbers<[1], [0], [0], [1], [0, 0, 1, 1], [], []>} : vector<16x128xbf16>, vector<128x64xbf16>, vector<16x64xf32> -> vector<16x64xf32>
    %192 = arith.addf %160, %191 : vector<16x64xf32>
    %c0_77 = arith.constant 0 : index
    %c0_78 = arith.constant 0 : index
    %193 = vector.load %arg7[%c0_77, %c0_78] : memref<1x64xf32, #tpu.memory_space<vmem>>, vector<1x64xf32>
    %194 = arith.mulf %192, %192 : vector<16x64xf32>
    %cst_79 = arith.constant dense<0.000000e+00> : vector<16xf32>
    %195 = vector.multi_reduction <add>, %194, %cst_79 [1] : vector<16x64xf32> to vector<16xf32>
    %196 = vector.shape_cast %195 : vector<16xf32> to vector<16x1xf32>
    %cst_80 = arith.constant 6.400000e+01 : f32
    %197 = vector.broadcast %cst_80 : f32 to vector<16x1xf32>
    %198 = arith.divf %196, %197 : vector<16x1xf32>
    %cst_81 = arith.constant 9.99999997E-7 : f32
    %199 = vector.broadcast %cst_81 : f32 to vector<16x1xf32>
    %200 = arith.addf %198, %199 : vector<16x1xf32>
    %201 = math.rsqrt %200 : vector<16x1xf32>
    %202 = vector.broadcast %201 : vector<16x1xf32> to vector<16x64xf32>
    %203 = arith.mulf %192, %202 : vector<16x64xf32>
    %204 = vector.broadcast %193 : vector<1x64xf32> to vector<16x64xf32>
    %205 = arith.mulf %203, %204 : vector<16x64xf32>
    %c0_82 = arith.constant 0 : index
    %c0_83 = arith.constant 0 : index
    %206 = vector.load %arg11[%c0_82, %c0_83] : memref<16x64xf32, #tpu.memory_space<vmem>>, vector<16x64xf32>
    tpu.vector_store %arg11[%c0_82, %c0_83], %205 {strides = array<i32>} : memref<16x64xf32, #tpu.memory_space<vmem>>, vector<16x64xf32>,
    return
  }
}

</mosaic_0001>

<bundles_post_ra>
// kernel: llama_model_forward.1
= control target key start
LH: loop header
LB: loop body
LE: loop exit
PB: predicated region body
PF: predicated region fallthrough
CT: control target
= control target key end

     0   :  { %vm63_vm0 = vcmask 523264   ;;  %v7215_v11 = vmov 0   ;;  %s8441_s0 = inlined_call_operand.vmem [shape: f32[16,64], index: 0, kind: input, shape index: {}]   ;;  %s8442_s1 = inlined_call_operand.vmem [shape: bf16[2,64,192], index: 1, kind: input, shape index: {}]   ;;  %s8443_s2 = inlined_call_operand.vmem [shape: bf16[2,64,64], index: 2, kind: input, shape index: {}]   ;;  %s8444_s3 = inlined_call_operand.vmem [shape: bf16[2,64,256], index: 3, kind: input, shape index: {}]   ;;  %s8445_s4 = inlined_call_operand.vmem [shape: bf16[2,128,64], index: 4, kind: input, shape index: {}]   ;;  %s8446_s5 = inlined_call_operand.vmem [shape: f32[2,1,64], index: 5, kind: input, shape index: {}]   ;;  %s8447_s6 = inlined_call_operand.vmem [shape: f32[2,1,64], index: 6, kind: input, shape index: {}]   ;;  %s8448_s7 = inlined_call_operand.vmem [shape: f32[1,64], index: 7, kind: input, shape index: {}]   ;;  %s8449_s8 = inlined_call_operand.vmem [shape: f32[16,64], index: 8, kind: input, shape index: {}]   ;;  %s8450_s9 = inlined_call_operand.vmem [shape: f32[16,64], index: 9, kind: input, shape index: {}]   ;;  %s8451_s10 = inlined_call_operand.vmem [shape: f32[64,64], index: 10, kind: input, shape index: {}]   ;;  %s8452_s11 = inlined_call_operand.hbm [shape: f32[16,64], index: 11, kind: output, shape index: {}]  }
   0x1   :  { %v40_v0 = vld [vmem:[%s8441_s0] sm:$0xff]  ;;  %v41_v1 = vld [vmem:[%s8441_s0 + $0x8] sm:$0xff]  ;;  %v7007_v6 = vld [vmem:[%s8442_s1 + $0x34] ss:$8 sps:$4 sm:$0xff]   ;;  %171 = vmatprep.mubr.bf16.mxu1 %v7215_v11 }
   0x2   :  { %v61_v2 = vmul.f32 %v40_v0, %v40_v0  ;;  %v62_v3 = vmul.f32 %v41_v1, %v41_v1  ;;  %v7009_v7 = vld [vmem:[%s8442_s1 + $0x30] ss:$8 sps:$4 sm:$0xff]   ;;  %v7010_v8 = vld [vmem:[%s8442_s1 + $0x24] ss:$8 sps:$4 sm:$0xff]   ;;  %147 = vmatprep.subr.bf16.mxu1 %v7007_v6  ;;  %v7012_v9 = vld [vmem:[%s8442_s1 + $0x20] ss:$8 sps:$4 sm:$0xff]  }
   0x3   :  { %148 = vmatpush1.bf16.msra.mxu1 %v7009_v7  ;;  %v7013_v10 = vld [vmem:[%s8442_s1 + $0x14] ss:$8 sps:$4 sm:$0xff]   ;;  %v7015_v12 = vld [vmem:[%s8442_s1 + $0x10] ss:$8 sps:$4 sm:$0xff]   ;;  %v7016_v13 = vld [vmem:[%s8442_s1 + $0x4] ss:$8 sps:$4 sm:$0xff]  }
   0x4   :  { %v64_v4 = vsel %vm63_vm0, %v61_v2, 0.0  ;;  %v67_v5 = vsel %vm63_vm0, %v62_v3, 0.0  ;;  %149 = vmatprep.subr.bf16.mxu1 %v7010_v8 }
   0x5   :  { %65 = vadd.xlane.f32.xlu0 %v64_v4 }
   0x7   :  { %150 = vmatpush1.bf16.msra.mxu1 %v7012_v9 }
   0x8   :  { %151 = vmatprep.subr.bf16.mxu1 %v7013_v10 }
   0x9   :  { %68 = vadd.xlane.f32.xlu0 %v67_v5 }
   0xa   :  { %16 = vsyncpa [#allocation3], 0  ;;  %v7018_v14 = vld [vmem:[%s8442_s1] ss:$8 sps:$4 sm:$0xff]   ;;  %v53_v16 = vld [vmem:[%s8451_s10 + $0x38] sm:$0xff]  ;;  %s7216_s22 = smov 64   ;;  %v54_v10 = vlaneseq }
   0xb   :  { %152 = vmatpush1.bf16.msra.mxu1 %v7015_v12  ;;  %v7326_v15 = vld [vmem:[%s8449_s8] sm:$0xff]  ;;  %6681 = vmatprep.subr.mxu0 %v53_v16  ;;  %v52_v17 = vld [vmem:[%s8451_s10 + $0x30] sm:$0xff]  ;;  %v51_v18 = vld [vmem:[%s8451_s10 + $0x28] sm:$0xff]  ;;  %s7217_s27 = smov 112   ;;  %s7218_s28 = smov 96   ;;  %v7220_v8 = vmov 0.0  }
   0xc   :  { %153 = vmatprep.subr.bf16.mxu1 %v7016_v13  ;;  %6682 = vmatpush3.msra.mxu0 %v53_v16  ;;  %v50_v19 = vld [vmem:[%s8451_s10 + $0x20] sm:$0xff]  ;;  %v49_v20 = vld [vmem:[%s8451_s10 + $0x18] sm:$0xff]  ;;  %v48_v21 = vld [vmem:[%s8451_s10 + $0x10] sm:$0xff]  ;;  %s7219_s29 = smov 80   ;;  %vm7221_vm1 = vmmov 0   ;;  %v7423_v12 = vshrl.u32 %v54_v10, 7 }
   0xd   :  { %6683 = vmatprep.subr.mxu0 %v52_v17  ;;  %v6329_v31 = vld [vmem:[%s8446_s5] ss:$0 sm:$0xff]  ;;  %v47_v36 = vld [vmem:[%s8451_s10 + $0x8] sm:$0xff]  ;;  %v7425_v13 = vand.u32 127, %v54_v10  ;;  %vm1268_vm3 = vcmask 130048   ;;  %vm1877_vm4 = vcmask 64512  }
   0xe   :  { %6684 = vmatpush3.msra.mxu0 %v52_v17  ;;  %v46_v37 = vld [vmem:[%s8451_s10] sm:$0xff]  ;;  %v43_v47 = vld [vmem:[%s8449_s8 + $0x8] sm:$0xff]  ;;  %s7224_s19 = smov 32   ;;  %s7225_s20 = smov 16   ;;  %vm2848_vm5 = vcmask 261120   ;;  %vm2851_vm6 = vcmask 392192  }
   0xf   :  { %154 = vmatpush1.bf16.msra.mxu1 %v7018_v14  ;;  %6685 = vmatprep.subr.mxu0 %v51_v18  ;;  %v44_v44 = vld [vmem:[%s8450_s9] sm:$0xff]  ;;  %v45_v48 = vld [vmem:[%s8450_s9 + $0x8] sm:$0xff]  ;;  %vm58_vm2 = vcmp.gt.s32.totalorder %v7425_v13, %v7423_v12  ;;  %s7226_s21 = smov 48   ;;  %s7227_s25 = smov [#allocation2]  }
  0x10   :  { %6662 = vmatprep.subr.mxu1 %v53_v16  ;;  %6686 = vmatpush3.msra.mxu0 %v51_v18  ;;  %s6318_s26 = sshll.u32 %s7227_s25, 4  ;;  %s6319_s26 = int_to_ptr.vmem [resolvable:$true] %s6318_s26 }
  0x11   :  { %6687 = vmatprep.subr.mxu0 %v50_v19  ;;  %s7193_s30 = scalar_lea.vmem %s6319_s26, 256  ;;  %p7198_p1 = scmp.lt.s32.totalorder %s6319_s26, %s6319_s26 }
  0x12   :  { %6688 = vmatpush3.msra.mxu0 %v50_v19  ;;  %p7194_p0 = scmp.ne.s32.totalorder %s6319_s26, %s7193_s30  ;;  %p7199_p2 = scmp.lt.s32.totalorder %s7193_s30, %s7193_s30 }
  0x13   :  { %6689 = vmatprep.subr.mxu0 %v49_v20 }
  0x14   :  { %6690 = vmatpush3.msra.mxu0 %v49_v20  ;;  %p7200_p3 = por %p7199_p2, %p7198_p1 }
  0x15   :  { %6691 = vmatprep.subr.mxu0 %v48_v21 }
  0x16   :  { %6692 = vmatpush3.msra.mxu0 %v48_v21  ;;  %p7201_p4 = pnand %p7200_p3, %p7194_p0 }
  0x17   :  { %6693 = vmatprep.subr.mxu0 %v47_v36 }
  0x18   :  { %6694 = vmatpush3.msra.mxu0 %v47_v36 }
  0x19   :  { %6695 = vmatprep.subr.mxu0 %v46_v37 }
  0x1a   :  { %6696 = vmatpush3.msra.mxu0 %v46_v37 }
  0x1b   :  { %6720 = vmatprep.subr.mxu0 %v7220_v8 }
  0x1f   :  { %271 = vrot.lane.b32.xlu0 %v7326_v15, %s7216_s22 }
  0x8e   :  { %v66_v22 = vpop.xlane.xlu0 %65 }
  0x8f   :  { %v71_v23 = vmul.f32 0.015625, %v66_v22 }
  0x91   :  { %v73_v24 = vadd.f32 1e-06, %v71_v23 }
  0x92   :  { %v69_v25 = vpop.xlane.xlu0 %68 }
  0x93   :  { %7079 = vrsqrt.f32 %v73_v24  ;;  %v72_v26 = vmul.f32 0.015625, %v69_v25 }
  0x95   :  { %v74_v27 = vadd.f32 1e-06, %v72_v26 }
  0x96   :  { %v7378_v50 = vpop.permute.xlu0 %271 }
  0x97   :  { %7081 = vrsqrt.f32 %v74_v27 }
  0xa0   :  { %v7080_v28 = vpop.eup %7079 }
  0xa1   :  { %v77_v29 = vmul.f32 %v7080_v28, %v40_v0 }
  0xa3   :  { %v85_v33 = vmul.f32 %v6329_v31, %v77_v29 }
  0xa4   :  { %v7082_v30 = vpop.eup %7081 }
  0xa5   :  { %v78_v32 = vmul.f32 %v7082_v30, %v41_v1 }
  0xa7   :  { %v86_v34 = vmul.f32 %v6329_v31, %v78_v32 }
  0xa9   :  { %v87_v35 = vpack.c.bf16 %v86_v34, %v85_v33 }
  0xab   :  { %6338 = vmatmul.mubr.msk.bf16.vlgmr.msra.gmra.mxu1 %vm63_vm0, %v87_v35 }
  0xac   :  { %6663 = vmatpush3.msra.mxu1 %v53_v16 }
  0xad   :  { %6664 = vmatprep.subr.mxu1 %v52_v17 }
  0xae   :  { %6665 = vmatpush3.msra.mxu1 %v52_v17 }
  0xaf   :  { %6666 = vmatprep.subr.mxu1 %v51_v18 }
  0xb0   :  { %6667 = vmatpush3.msra.mxu1 %v51_v18  ;;  %v7223_v18 = vmov 1934713408  }
  0xb1   :  { %6668 = vmatprep.subr.mxu1 %v50_v19 }
  0xb2   :  { %6669 = vmatpush3.msra.mxu1 %v50_v19  ;;  %v429_v19 = vunpack.c.l.s4 %v7223_v18 }
  0xb3   :  { %6670 = vmatprep.subr.mxu1 %v49_v20 }
  0xb4   :  { %6671 = vmatpush3.msra.mxu1 %v49_v20  ;;  %v430_v23 = vunpack.c.0.s8 %v429_v19 }
  0xb5   :  { %6672 = vmatprep.subr.mxu1 %v48_v21 }
  0xb6   :  { %6673 = vmatpush3.msra.mxu1 %v48_v21  ;;  %v7433_v31 = vsub.s32 %v430_v23, %v7423_v12 }
  0xb7   :  { %6674 = vmatprep.subr.mxu1 %v47_v36 }
  0xb8   :  { %6675 = vmatpush3.msra.mxu1 %v47_v36 }
  0xb9   :  { %6676 = vmatprep.subr.mxu1 %v46_v37 }
  0xba   :  { %6677 = vmatpush3.msra.mxu1 %v46_v37 }
  0xbb   :  { %6700 = vmatprep.subr.mxu1 %v7220_v8 }
 0x16b   :  { %v173_v38 = vpop.f32.mrf.mxu1 }
 0x16c   :  { %279 = vrot.lane.b32.xlu1 %v173_v38, %s7216_s22  ;;  %6678 = vmatprep.mubr.msk.f32.mxu1 %vm63_vm0, %v173_v38  ;;  %v277_v51 = vmul.f32 %v7378_v50, %v173_v38  ;;  %v182_v62 = vmul.f32 %v173_v38, %v7326_v15  ;;  %v7222_v15 = vmov 1983009808  }
 0x16d   :  { %v7360_v39 = vpop.f32.mrf.mxu1  ;;  %v397_v16 = vunpack.c.l.s4 %v7222_v15 }
 0x16f   :  { %v177_v40 = vpop.f32.mrf.mxu1  ;;  %v398_v20 = vunpack.c.0.s8 %v397_v16 }
 0x170   :  { %281 = vrot.lane.b32.xlu1 %v177_v40, %s7216_s22  ;;  %6679 = vmatmul.mubr.msk.f32.vlgmr.msra.gmra.mxu1 %vm63_vm0, %v177_v40  ;;  %v183_v6 = vmul.f32 %v177_v40, %v43_v47 }
 0x171   :  { %v7382_v54 = vpop.f32.mrf.mxu1  ;;  %6702 = vmatprep.mubr.msk.f32.mxu1 %vm7221_vm1, %v7220_v8  ;;  %v7430_v24 = vsub.s32 %v398_v20, %v7423_v12 }
 0x1de   :  { %v280_v41 = vpop.permute.xlu1 %279 }
 0x1df   :  { %6697 = vmatprep.mubr.msk.f32.mxu0 %vm63_vm0, %v280_v41 }
 0x1e2   :  { %v282_v42 = vpop.permute.xlu1 %281 }
 0x1e3   :  { %6698 = vmatmul.mubr.msk.f32.vlgmr.msra.gmra.mxu0 %vm63_vm0, %v282_v42 }
 0x1e4   :  { %6722 = vmatprep.mubr.msk.f32.mxu0 %vm7221_vm1, %v7220_v8 }
 0x230   :  { %v6680_v56 = vpop.f32.mrf.mxu1 }
 0x231   :  { %v266_v4 = vmul.f32 %v6680_v56, %v45_v48 }
 0x232   :  { %v256_v60 = vpop.f32.mrf.mxu1 }
 0x233   :  { %v265_v61 = vmul.f32 %v256_v60, %v44_v44  ;;  %v7408_v7 = vadd.f32 %v266_v4, %v183_v6 }
 0x235   :  { %v7393_v63 = vadd.f32 %v265_v61, %v182_v62 }
 0x2a3   :  { %v6699_v43 = vpop.f32.mrf.mxu0 }
 0x2a4   :  { %v363_v49 = vmul.f32 %v6699_v43, %v45_v48 }
 0x2a5   :  { %v353_v45 = vpop.f32.mrf.mxu0 }
 0x2a6   :  { %v362_v46 = vmul.f32 %v353_v45, %v44_v44 }
 0x2a8   :  { %366 = vrot.lane.b32.xlu1 %v362_v46, %s7216_s22 }
 0x2ac   :  { %273 = vrot.lane.b32.xlu1 %v43_v47, %s7216_s22 }
 0x2b0   :  { %368 = vrot.lane.b32.xlu1 %v363_v49, %s7216_s22 }
 0x31a   :  { %v367_v52 = vpop.permute.xlu1 %366 }
 0x31b   :  { %v372_v53 = vadd.f32 %v367_v52, %v277_v51 }
 0x31d   :  { %668 = vrot.lane.b32.xlu1 %v372_v53, %s7217_s27 }
 0x31e   :  { %v7384_v55 = vpop.permute.xlu1 %273 }
 0x31f   :  { %v278_v57 = vmul.f32 %v7384_v55, %v177_v40 }
 0x321   :  { %672 = vrot.lane.b32.xlu1 %v372_v53, %s7218_s28 }
 0x322   :  { %v369_v58 = vpop.permute.xlu1 %368 }
 0x323   :  { %v373_v59 = vadd.f32 %v369_v58, %v278_v57 }
 0x325   :  { %670 = vrot.lane.b32.xlu0 %v373_v59, %s7217_s27  ;;  %676 = vrot.lane.b32.xlu1 %v372_v53, %s7219_s29 }
 0x329   :  { %678 = vrot.lane.b32.xlu0 %v373_v59, %s7219_s29  ;;  %674 = vrot.lane.b32.xlu1 %v373_v59, %s7218_s28 }
 0x32d   :  { %376 = vrot.lane.b32.xlu1 %v7393_v63, %s7217_s27 }
 0x331   :  { %680 = vrot.lane.b32.xlu1 %v372_v53, %s7216_s22 }
 0x38f   :  { %v669_v0 = vpop.permute.xlu1 %668 }
 0x390   :  { %684 = vrot.lane.b32.xlu0 %v669_v0, %s7216_s22 }
 0x393   :  { %v673_v1 = vpop.permute.xlu1 %672 }
 0x394   :  { %688 = vrot.lane.b32.xlu1 %v673_v1, %s7216_s22 }
 0x397   :  { %v677_v2 = vpop.permute.xlu1 %676  ;;  %v671_v3 = vpop.permute.xlu0 %670 }
 0x398   :  { %388 = vrot.lane.b32.xlu1 %v7393_v63, %s7219_s29  ;;  %692 = vrot.lane.b32.xlu0 %v677_v2, %s7216_s22 }
 0x39b   :  { %v679_v5 = vpop.permute.xlu0 %678  ;;  %v675_v9 = vpop.permute.xlu1 %674 }
 0x39c   :  { %382 = vrot.lane.b32.xlu0 %v7393_v63, %s7218_s28  ;;  %686 = vrot.lane.b32.xlu1 %v671_v3, %s7216_s22 }
 0x39f   :  { %v377_v14 = vpop.permute.xlu1 %376 }
 0x3a0   :  { %682 = vrot.lane.b32.xlu0 %v373_v59, %s7216_s22  ;;  %694 = vrot.lane.b32.xlu1 %v679_v5, %s7216_s22 }
 0x3a3   :  { %v681_v17 = vpop.permute.xlu1 %680 }
 0x3a4   :  { %690 = vrot.lane.b32.xlu0 %v675_v9, %s7216_s22  ;;  %384 = vrot.lane.b32.xlu1 %v7408_v7, %s7218_s28 }
 0x3a8   :  { %378 = vrot.lane.b32.xlu0 %v7408_v7, %s7217_s27 }
 0x3ac   :  { %390 = vrot.lane.b32.xlu0 %v7408_v7, %s7219_s29 }
 0x402   :  { %v685_v21 = vpop.permute.xlu0 %684 }
 0x406   :  { %v689_v22 = vpop.permute.xlu1 %688 }
 0x407   :  { %v704_v25 = vcombine.low %v681_v17, %v689_v22  ;;  %v705_v26 = vcombine.high %v681_v17, %v689_v22 }
 0x409   :  { %v712_v32 = vrot.slane %v704_v25, %v7430_v24  ;;  %v719_v33 = vrot.slane %v705_v26, %v7430_v24 }
 0x40a   :  { %v389_v27 = vpop.permute.xlu1 %388  ;;  %v693_v28 = vpop.permute.xlu0 %692 }
 0x40b   :  { %v720_v29 = vcombine.low %v685_v21, %v693_v28  ;;  %v721_v30 = vcombine.high %v685_v21, %v693_v28  ;;  %v410_v36 = vcombine.low %v377_v14, %v389_v27  ;;  %v411_v37 = vcombine.high %v377_v14, %v389_v27 }
 0x40d   :  { %v728_v34 = vrot.slane %v720_v29, %v7430_v24  ;;  %v735_v35 = vrot.slane %v721_v30, %v7430_v24  ;;  %v418_v52 = vrot.slane %v410_v36, %v7430_v24  ;;  %v425_v53 = vrot.slane %v411_v37, %v7430_v24 }
 0x40e   :  { %v687_v38 = vpop.permute.xlu1 %686  ;;  %v383_v40 = vpop.permute.xlu0 %382 }
 0x40f   :  { %v736_v41 = vcombine.low %v712_v32, %v728_v34  ;;  %v737_v42 = vcombine.high %v712_v32, %v728_v34  ;;  %v752_v43 = vcombine.low %v719_v33, %v735_v35  ;;  %v753_v44 = vcombine.high %v719_v33, %v735_v35 }
 0x410   :  { %v394_v45 = vcombine.low %v7393_v63, %v383_v40  ;;  %v395_v46 = vcombine.high %v7393_v63, %v383_v40 }
 0x411   :  { %v744_v47 = vrot.slane %v736_v41, %v7433_v31  ;;  %v751_v48 = vrot.slane %v737_v42, %v7433_v31  ;;  %v760_v49 = vrot.slane %v752_v43, %v7433_v31  ;;  %v767_v51 = vrot.slane %v753_v44, %v7433_v31 }
 0x412   :  { %v402_v56 = vrot.slane %v394_v45, %v7430_v24  ;;  %v409_v57 = vrot.slane %v395_v46, %v7430_v24  ;;  %v695_v58 = vpop.permute.xlu1 %694  ;;  %v683_v59 = vpop.permute.xlu0 %682 }
 0x413   :  { %v840_v60 = vcombine.low %v744_v47, %v751_v48  ;;  %v6347_v61 = vcombine.high %v744_v47, %v751_v48  ;;  %v856_v62 = vcombine.low %v760_v49, %v767_v51  ;;  %v6348_v63 = vcombine.high %v760_v49, %v767_v51 }
 0x414   :  { %v426_v0 = vcombine.low %v402_v56, %v418_v52  ;;  %v427_v1 = vcombine.high %v402_v56, %v418_v52  ;;  %v442_v2 = vcombine.low %v409_v57, %v425_v53  ;;  %v443_v3 = vcombine.high %v409_v57, %v425_v53 }
 0x415   :  { %v847_v4 = vrot.slane %v840_v60, %v7430_v24  ;;  %v855_v5 = vrot.slane %v6347_v61, %v7430_v24  ;;  %v863_v6 = vrot.slane %v856_v62, %v7430_v24  ;;  %v871_v9 = vrot.slane %v6348_v63, %v7430_v24 }
 0x416   :  { %v434_v10 = vrot.slane %v426_v0, %v7433_v31  ;;  %v441_v14 = vrot.slane %v427_v1, %v7433_v31  ;;  %v450_v15 = vrot.slane %v442_v2, %v7433_v31  ;;  %v457_v16 = vrot.slane %v443_v3, %v7433_v31  ;;  %v385_v17 = vpop.permute.xlu1 %384  ;;  %v691_v18 = vpop.permute.xlu0 %690 }
 0x417   :  { %v872_v19 = vcombine.low %v847_v4, %v855_v5  ;;  %v873_v20 = vcombine.high %v847_v4, %v855_v5  ;;  %v888_v21 = vcombine.low %v863_v6, %v871_v9  ;;  %v889_v22 = vcombine.high %v863_v6, %v871_v9 }
 0x418   :  { %v530_v23 = vcombine.low %v434_v10, %v441_v14  ;;  %v6343_v25 = vcombine.high %v434_v10, %v441_v14  ;;  %v546_v26 = vcombine.low %v450_v15, %v457_v16  ;;  %v6344_v27 = vcombine.high %v450_v15, %v457_v16 }
 0x419   :  { %v788_v28 = vcombine.low %v687_v38, %v695_v58  ;;  %v789_v29 = vcombine.high %v687_v38, %v695_v58  ;;  %v462_v30 = vcombine.low %v7408_v7, %v385_v17  ;;  %v463_v32 = vcombine.high %v7408_v7, %v385_v17 }
 0x41a   :  { %v537_v33 = vrot.slane %v530_v23, %v7430_v24  ;;  %v545_v34 = vrot.slane %v6343_v25, %v7430_v24  ;;  %v7462_v35 = vrot.slane %v546_v26, %v7430_v24  ;;  %v7465_v36 = vrot.slane %v6344_v27, %v7430_v24  ;;  %v379_v37 = vpop.permute.xlu0 %378 }
 0x41b   :  { %v796_v40 = vrot.slane %v788_v28, %v7430_v24  ;;  %v803_v41 = vrot.slane %v789_v29, %v7430_v24  ;;  %v470_v38 = vrot.slane %v462_v30, %v7430_v24  ;;  %v477_v42 = vrot.slane %v463_v32, %v7430_v24 }
 0x41c   :  { %v562_v7 = vcombine.low %v537_v33, %v545_v34  ;;  %v563_v43 = vcombine.high %v537_v33, %v545_v34  ;;  %v578_v44 = vcombine.low %v7462_v35, %v7465_v36  ;;  %v579_v45 = vcombine.high %v7462_v35, %v7465_v36 }
 0x41d   :  { %v772_v46 = vcombine.low %v683_v59, %v691_v18  ;;  %v773_v47 = vcombine.high %v683_v59, %v691_v18  ;;  %v880_v48 = vrot.slane %v872_v19, %v7433_v31  ;;  %v896_v49 = vrot.slane %v888_v21, %v7433_v31 }
 0x41e   :  { %v391_v51 = vpop.permute.xlu0 %390  ;;  %v570_v52 = vrot.slane %v562_v7, %v7433_v31  ;;  %v586_v53 = vrot.slane %v578_v44, %v7433_v31  ;;  %v7480_v56 = vrot.slane %v873_v20, %v7433_v31  ;;  %v7483_v57 = vrot.slane %v889_v22, %v7433_v31 }
 0x41f   :  { %v780_v58 = vrot.slane %v772_v46, %v7430_v24  ;;  %v787_v60 = vrot.slane %v773_v47, %v7430_v24  ;;  %v904_v59 = vcombine.low %v880_v48, %v896_v49  ;;  %v478_v61 = vcombine.low %v379_v37, %v391_v51 }
 0x420   :  { %v479_v62 = vcombine.high %v379_v37, %v391_v51  ;;  %v594_v63 = vcombine.low %v570_v52, %v586_v53  ;;  %v905_v0 = vcombine.high %v880_v48, %v896_v49  ;;  %v595_v1 = vcombine.high %v570_v52, %v586_v53 }
 0x421   :  { %v804_v2 = vcombine.low %v780_v58, %v796_v40  ;;  %v805_v3 = vcombine.high %v780_v58, %v796_v40  ;;  %v820_v4 = vcombine.low %v787_v60, %v803_v41  ;;  %v821_v5 = vcombine.high %v787_v60, %v803_v41  ;;  %6701 = vmatpush3.xpose.msk.msra.mxu1 %vm1268_vm3, %v904_v59 }
 0x422   :  { %v486_v6 = vrot.slane %v478_v61, %v7430_v24  ;;  %v493_v9 = vrot.slane %v479_v62, %v7430_v24  ;;  %6705 = vmatprep.subr.mxu1 %v7220_v8  ;;  %v906_v10 = vcombine.low %v7480_v56, %v7483_v57  ;;  %v7494_v14 = vrot.slane %v563_v43, %v7433_v31 }
 0x423   :  { %v812_v15 = vrot.slane %v804_v2, %v7433_v31  ;;  %v819_v16 = vrot.slane %v805_v3, %v7433_v31  ;;  %v828_v17 = vrot.slane %v820_v4, %v7433_v31  ;;  %v835_v18 = vrot.slane %v821_v5, %v7433_v31 }
 0x424   :  { %v494_v19 = vcombine.low %v470_v38, %v486_v6  ;;  %v495_v20 = vcombine.high %v470_v38, %v486_v6  ;;  %v510_v21 = vcombine.low %v477_v42, %v493_v9  ;;  %v511_v22 = vcombine.high %v477_v42, %v493_v9  ;;  %6703 = vmatmul.mubr.msk.f32.vlgmr.msra.gmra.mxu1 %vm1268_vm3, %v594_v63 }
 0x425   :  { %v908_v23 = vcombine.low %v812_v15, %v819_v16  ;;  %v6349_v25 = vcombine.high %v812_v15, %v819_v16  ;;  %v924_v26 = vcombine.low %v828_v17, %v835_v18  ;;  %v6350_v27 = vcombine.high %v828_v17, %v835_v18  ;;  %6706 = vmatpush3.xpose.msk.msra.mxu1 %vm1268_vm3, %v905_v0 }
 0x426   :  { %v502_v28 = vrot.slane %v494_v19, %v7433_v31  ;;  %v509_v29 = vrot.slane %v495_v20, %v7433_v31  ;;  %v518_v30 = vrot.slane %v510_v21, %v7433_v31  ;;  %v525_v32 = vrot.slane %v511_v22, %v7433_v31  ;;  %6707 = vmatprep.mubr.msk.f32.mxu1 %vm7221_vm1, %v7220_v8 }
 0x427   :  { %v915_v33 = vrot.slane %v908_v23, %v7430_v24  ;;  %v923_v34 = vrot.slane %v6349_v25, %v7430_v24  ;;  %v931_v37 = vrot.slane %v924_v26, %v7430_v24  ;;  %v939_v40 = vrot.slane %v6350_v27, %v7430_v24  ;;  %6710 = vmatprep.subr.mxu1 %v7220_v8 }
 0x428   :  { %v598_v41 = vcombine.low %v502_v28, %v509_v29  ;;  %v6345_v38 = vcombine.high %v502_v28, %v509_v29  ;;  %v614_v42 = vcombine.low %v518_v30, %v525_v32  ;;  %v6346_v7 = vcombine.high %v518_v30, %v525_v32  ;;  %6708 = vmatmul.mubr.msk.f32.vlgmr.msra.gmra.mxu1 %vm1268_vm3, %v595_v1 }
 0x429   :  { %v940_v43 = vcombine.low %v915_v33, %v923_v34  ;;  %v941_v44 = vcombine.high %v915_v33, %v923_v34  ;;  %v956_v46 = vcombine.low %v931_v37, %v939_v40  ;;  %v957_v47 = vcombine.high %v931_v37, %v939_v40  ;;  %6711 = vmatpush3.xpose.msk.msra.mxu1 %vm1268_vm3, %v906_v10 }
 0x42a   :  { %v605_v48 = vrot.slane %v598_v41, %v7430_v24  ;;  %v613_v49 = vrot.slane %v6345_v38, %v7430_v24  ;;  %v621_v51 = vrot.slane %v614_v42, %v7430_v24  ;;  %v629_v52 = vrot.slane %v6346_v7, %v7430_v24  ;;  %6712 = vmatprep.mubr.msk.f32.mxu1 %vm7221_vm1, %v7220_v8 }
 0x42b   :  { %6715 = vmatprep.subr.mxu1 %v7220_v8  ;;  %v593_v53 = vrot.slane %v579_v45, %v7433_v31  ;;  %v948_v58 = vrot.slane %v940_v43, %v7433_v31  ;;  %v964_v60 = vrot.slane %v956_v46, %v7433_v31  ;;  %v907_v1 = vcombine.high %v7480_v56, %v7483_v57 }
 0x42c   :  { %v630_v59 = vcombine.low %v605_v48, %v613_v49  ;;  %v631_v61 = vcombine.high %v605_v48, %v613_v49  ;;  %v646_v62 = vcombine.low %v621_v51, %v629_v52  ;;  %v647_v63 = vcombine.high %v621_v51, %v629_v52 }
 0x42d   :  { %v596_v0 = vcombine.low %v7494_v14, %v593_v53  ;;  %v972_v2 = vcombine.low %v948_v58, %v964_v60  ;;  %v955_v35 = vrot.slane %v941_v44, %v7433_v31  ;;  %v971_v36 = vrot.slane %v957_v47, %v7433_v31 }
 0x42e   :  { %v638_v3 = vrot.slane %v630_v59, %v7433_v31  ;;  %v654_v4 = vrot.slane %v646_v62, %v7433_v31  ;;  %v645_v56 = vrot.slane %v631_v61, %v7433_v31  ;;  %v661_v57 = vrot.slane %v647_v63, %v7433_v31 }
 0x42f   :  { %6713 = vmatmul.mubr.msk.f32.vlgmr.msra.gmra.mxu1 %vm1268_vm3, %v596_v0  ;;  %6721 = vmatpush3.xpose.msk.msra.mxu0 %vm1268_vm3, %v972_v2  ;;  %v597_v5 = vcombine.high %v7494_v14, %v593_v53  ;;  %v974_v6 = vcombine.low %v955_v35, %v971_v36  ;;  %v973_v9 = vcombine.high %v948_v58, %v964_v60  ;;  %v7570_v17 = vsel %vm58_vm2, -1e+30, %v7220_v8 }
 0x430   :  { %6716 = vmatpush3.xpose.msk.msra.mxu1 %vm1268_vm3, %v907_v1  ;;  %6717 = vmatprep.mubr.msk.f32.mxu1 %vm7221_vm1, %v7220_v8  ;;  %v662_v45 = vcombine.low %v638_v3, %v654_v4  ;;  %v663_v10 = vcombine.high %v638_v3, %v654_v4  ;;  %v664_v15 = vcombine.low %v645_v56, %v661_v57 }
 0x431   :  { %6725 = vmatprep.subr.mxu1 %v7220_v8  ;;  %6730 = vmatprep.subr.mxu0 %v7220_v8  ;;  %v975_v14 = vcombine.high %v955_v35, %v971_v36  ;;  %v665_v16 = vcombine.high %v645_v56, %v661_v57 }
 0x432   :  { %6723 = vmatmul.mubr.msk.f32.vlgmr.msra.gmra.mxu0 %vm1268_vm3, %v662_v45 }
 0x433   :  { %6718 = vmatmul.mubr.msk.f32.vlgmr.msra.gmra.mxu1 %vm1268_vm3, %v597_v5  ;;  %6731 = vmatpush3.xpose.msk.msra.mxu0 %vm1268_vm3, %v974_v6 }
 0x434   :  { %6726 = vmatpush3.xpose.msk.msra.mxu1 %vm1268_vm3, %v973_v9  ;;  %6727 = vmatprep.mubr.msk.f32.mxu1 %vm7221_vm1, %v7220_v8 }
 0x435   :  { %6735 = vmatprep.subr.mxu1 %v7220_v8  ;;  %6732 = vmatprep.mubr.msk.f32.mxu0 %vm7221_vm1, %v7220_v8 }
 0x436   :  { %6733 = vmatmul.mubr.msk.f32.vlgmr.msra.gmra.mxu0 %vm1268_vm3, %v664_v15  ;;  %6740 = vmatprep.subr.mxu0 %v7220_v8 }
 0x437   :  { %6728 = vmatmul.mubr.msk.f32.vlgmr.msra.gmra.mxu1 %vm1268_vm3, %v663_v10  ;;  %6742 = vmatprep.mubr.msk.f32.mxu0 %vm7221_vm1, %v7220_v8 }
 0x438   :  { %6736 = vmatpush3.xpose.msk.msra.mxu1 %vm1268_vm3, %v975_v14  ;;  %6737 = vmatprep.mubr.msk.f32.mxu1 %vm7221_vm1, %v7220_v8 }
 0x439   :  { %6745 = vmatprep.subr.mxu1 %v7220_v8 }
 0x43b   :  { %6738 = vmatmul.mubr.msk.f32.vlgmr.msra.gmra.mxu1 %vm1268_vm3, %v665_v16 }
 0x43c   :  { %6747 = vmatprep.mubr.msk.f32.mxu1 %vm7221_vm1, %v7220_v8 }
 0x4e4   :  { %v1341_v18 = vpop.f32.mrf.mxu1 }
 0x4e5   :  { %v1342_v19 = vadd.f32 %v1341_v18, %v7570_v17 }
 0x4e6   :  { %v6704_v20 = vpop.f32.mrf.mxu1 }
 0x4e7   :  { %v1878_v21 = vsel %vm1877_vm4, %v1342_v19, -inf }
 0x4e8   :  { %1879 = vmax.xlane.f32.xlu1 %v1878_v21  ;;  %v1417_v22 = vpop.f32.mrf.mxu1 }
 0x4e9   :  { %v1418_v12 = vadd.f32 %v1417_v22, %v7570_v17 }
 0x4ea   :  { %v6709_v23 = vpop.f32.mrf.mxu1 }
 0x4eb   :  { %v1881_v38 = vsel %vm1877_vm4, %v1418_v12, -inf }
 0x4ef   :  { %v1493_v25 = vpop.f32.mrf.mxu1 }
 0x4f0   :  { %v1494_v40 = vadd.f32 %v1493_v25, %v7570_v17 }
 0x4f1   :  { %v6714_v26 = vpop.f32.mrf.mxu1 }
 0x4f2   :  { %v1645_v27 = vpop.f32.mrf.mxu0  ;;  %v1884_v44 = vsel %vm1877_vm4, %v1494_v40, -inf }
 0x4f3   :  { %v1569_v28 = vpop.f32.mrf.mxu1  ;;  %v1646_v29 = vadd.f32 %v1645_v27, %v7570_v17 }
 0x4f4   :  { %v6724_v30 = vpop.f32.mrf.mxu0  ;;  %v1570_v47 = vadd.f32 %v1569_v28, %v7570_v17 }
 0x4f5   :  { %v6719_v13 = vpop.f32.mrf.mxu1  ;;  %v1890_v32 = vsel %vm1877_vm4, %v1646_v29, -inf }
 0x4f6   :  { %1891 = vmax.xlane.f32.xlu0 %v1890_v32  ;;  %v1797_v33 = vpop.f32.mrf.mxu0  ;;  %v1887_v49 = vsel %vm1877_vm4, %v1570_v47, -inf }
 0x4f7   :  { %v1721_v34 = vpop.f32.mrf.mxu1  ;;  %v1798_v7 = vadd.f32 %v1797_v33, %v7570_v17 }
 0x4f8   :  { %v6734_v37 = vpop.f32.mrf.mxu0  ;;  %v1722_v48 = vadd.f32 %v1721_v34, %v7570_v17 }
 0x4f9   :  { %v6729_v41 = vpop.f32.mrf.mxu1  ;;  %984 = vrot.lane.b32.xlu1 %v7360_v39, %s7218_s28  ;;  %v1896_v46 = vsel %vm1877_vm4, %v1798_v7, -inf }
 0x4fa   :  { %1882 = vmax.xlane.f32.xlu0 %v1881_v38  ;;  %v1893_v52 = vsel %vm1877_vm4, %v1722_v48, -inf }
 0x4fb   :  { %v1873_v42 = vpop.f32.mrf.mxu1 }
 0x4fc   :  { %v1874_v51 = vadd.f32 %v1873_v42, %v7570_v17 }
 0x4fd   :  { %v6739_v43 = vpop.f32.mrf.mxu1 }
 0x4fe   :  { %1885 = vmax.xlane.f32.xlu0 %v1884_v44  ;;  %v1899_v53 = vsel %vm1877_vm4, %v1874_v51, -inf }
 0x502   :  { %1897 = vmax.xlane.f32.xlu0 %v1896_v46 }
 0x518   :  { %978 = vrot.lane.b32.xlu0 %v7360_v39, %s7217_s27 }
 0x51c   :  { %980 = vrot.lane.b32.xlu0 %v7382_v54, %s7217_s27 }
 0x51d   :  { %1888 = vmax.xlane.f32.xlu1 %v1887_v49 }
 0x521   :  { %1894 = vmax.xlane.f32.xlu1 %v1893_v52 }
 0x525   :  { %1900 = vmax.xlane.f32.xlu1 %v1899_v53 }
 0x536   :  { %990 = vrot.lane.b32.xlu1 %v7360_v39, %s7219_s29 }
 0x571   :  { %v1880_v58 = vpop.xlane.xlu1 %1879 }
 0x572   :  { %v1902_v60 = vsub.f32 %v1342_v19, %v1880_v58 }
 0x574   :  { %v1910_v62 = vmul.f32 1.442695, %v1902_v60 }
 0x575   :  { %v985_v19 = vpop.permute.xlu1 %984 }
 0x576   :  { %v996_v30 = vcombine.low %v7360_v39, %v985_v19 }
 0x57f   :  { %v1892_v59 = vpop.xlane.xlu0 %1891 }
 0x580   :  { %v1906_v61 = vsub.f32 %v1646_v29, %v1892_v59 }
 0x582   :  { %v1918_v63 = vmul.f32 1.442695, %v1906_v61 }
 0x583   :  { %v1883_v0 = vpop.xlane.xlu0 %1882 }
 0x584   :  { %7083 = vpow2.f32 %v1918_v63  ;;  %v1903_v1 = vsub.f32 %v1418_v12, %v1883_v0  ;;  %v997_v12 = vcombine.high %v7360_v39, %v985_v19 }
 0x585   :  { %7085 = vpow2.f32 %v1910_v62 }
 0x586   :  { %v1912_v2 = vmul.f32 1.442695, %v1903_v1  ;;  %v1011_v41 = vrot.slane %v997_v12, %v7430_v24 }
 0x587   :  { %v1886_v3 = vpop.xlane.xlu0 %1885 }
 0x588   :  { %7087 = vpow2.f32 %v1912_v2  ;;  %v1904_v4 = vsub.f32 %v1494_v40, %v1886_v3  ;;  %v1004_v40 = vrot.slane %v996_v30, %v7430_v24 }
 0x58a   :  { %v1914_v45 = vmul.f32 1.442695, %v1904_v4 }
 0x58b   :  { %v1898_v35 = vpop.xlane.xlu0 %1897 }
 0x58c   :  { %v1908_v36 = vsub.f32 %v1798_v7, %v1898_v35 }
 0x58e   :  { %v1922_v56 = vmul.f32 1.442695, %v1908_v36 }
 0x58f   :  { %v979_v32 = vpop.permute.xlu0 %978 }
 0x590   :  { %7089 = vpow2.f32 %v1922_v56 }
 0x591   :  { %v7596_v57 = vpop.eup %7083  ;;  %7091 = vpow2.f32 %v1914_v45 }
 0x592   :  { %v1938_v5 = vsel %vm1877_vm4, %v7596_v57, 0.0  ;;  %v7600_v6 = vpop.eup %7085 }
 0x593   :  { %1939 = vadd.xlane.f32.xlu0 %v1938_v5  ;;  %v1926_v15 = vsel %vm1877_vm4, %v7600_v6, 0.0 }
 0x595   :  { %v7602_v9 = vpop.eup %7087 }
 0x596   :  { %v1929_v10 = vsel %vm1877_vm4, %v7602_v9, 0.0 }
 0x597   :  { %1930 = vadd.xlane.f32.xlu1 %v1929_v10  ;;  %1927 = vadd.xlane.f32.xlu0 %v1926_v15 }
 0x59d   :  { %v7608_v14 = vpop.eup %7089 }
 0x59e   :  { %v1944_v16 = vsel %vm1877_vm4, %v7608_v14, 0.0  ;;  %v7612_v18 = vpop.eup %7091 }
 0x59f   :  { %1945 = vadd.xlane.f32.xlu0 %v1944_v16  ;;  %v1932_v20 = vsel %vm1877_vm4, %v7612_v18, 0.0 }
 0x5a3   :  { %1933 = vadd.xlane.f32.xlu0 %v1932_v20 }
 0x5a6   :  { %v1889_v21 = vpop.xlane.xlu1 %1888 }
 0x5a7   :  { %v1905_v22 = vsub.f32 %v1570_v47, %v1889_v21 }
 0x5a9   :  { %v1916_v23 = vmul.f32 1.442695, %v1905_v22 }
 0x5aa   :  { %v1895_v25 = vpop.xlane.xlu1 %1894 }
 0x5ab   :  { %7093 = vpow2.f32 %v1916_v23  ;;  %v1907_v26 = vsub.f32 %v1722_v48, %v1895_v25  ;;  %v981_v23 = vpop.permute.xlu0 %980 }
 0x5ad   :  { %v1920_v27 = vmul.f32 1.442695, %v1907_v26 }
 0x5ae   :  { %v1901_v28 = vpop.xlane.xlu1 %1900 }
 0x5af   :  { %7095 = vpow2.f32 %v1920_v27  ;;  %v1909_v29 = vsub.f32 %v1874_v51, %v1901_v28 }
 0x5b1   :  { %v1924_v13 = vmul.f32 1.442695, %v1909_v29 }
 0x5b2   :  { %v991_v33 = vpop.permute.xlu1 %990 }
 0x5b3   :  { %7097 = vpow2.f32 %v1924_v13  ;;  %v1012_v34 = vcombine.low %v979_v32, %v991_v33  ;;  %v1013_v37 = vcombine.high %v979_v32, %v991_v33 }
 0x5b5   :  { %v1020_v38 = vrot.slane %v1012_v34, %v7430_v24  ;;  %v1027_v42 = vrot.slane %v1013_v37, %v7430_v24 }
 0x5b7   :  { %v1028_v7 = vcombine.low %v1004_v40, %v1020_v38  ;;  %v1029_v43 = vcombine.high %v1004_v40, %v1020_v38  ;;  %v1044_v44 = vcombine.low %v1011_v41, %v1027_v42  ;;  %v1045_v46 = vcombine.high %v1011_v41, %v1027_v42 }
 0x5b8   :  { %v7622_v47 = vpop.eup %7093 }
 0x5b9   :  { %v1036_v39 = vrot.slane %v1028_v7, %v7433_v31  ;;  %v1043_v48 = vrot.slane %v1029_v43, %v7433_v31  ;;  %v1052_v49 = vrot.slane %v1044_v44, %v7433_v31  ;;  %v1059_v51 = vrot.slane %v1045_v46, %v7433_v31  ;;  %992 = vrot.lane.b32.xlu0 %v7382_v54, %s7219_s29 }
 0x5ba   :  { %v1935_v52 = vsel %vm1877_vm4, %v7622_v47, 0.0 }
 0x5bb   :  { %v1132_v53 = vcombine.low %v1036_v39, %v1043_v48  ;;  %v6351_v58 = vcombine.high %v1036_v39, %v1043_v48  ;;  %v1148_v60 = vcombine.low %v1052_v49, %v1059_v51  ;;  %v6352_v59 = vcombine.high %v1052_v49, %v1059_v51  ;;  %1936 = vadd.xlane.f32.xlu1 %v1935_v52 }
 0x5bc   :  { %v7632_v61 = vpop.eup %7095 }
 0x5bd   :  { %v1139_v62 = vrot.slane %v1132_v53, %v7430_v24  ;;  %v1147_v63 = vrot.slane %v6351_v58, %v7430_v24  ;;  %v1155_v0 = vrot.slane %v1148_v60, %v7430_v24  ;;  %v1163_v1 = vrot.slane %v6352_v59, %v7430_v24 }
 0x5be   :  { %v1941_v2 = vsel %vm1877_vm4, %v7632_v61, 0.0 }
 0x5bf   :  { %1942 = vadd.xlane.f32.xlu1 %v1941_v2  ;;  %v1164_v3 = vcombine.low %v1139_v62, %v1147_v63  ;;  %v1180_v4 = vcombine.low %v1155_v0, %v1163_v1  ;;  %v1165_v35 = vcombine.high %v1139_v62, %v1147_v63  ;;  %v1181_v36 = vcombine.high %v1155_v0, %v1163_v1 }
 0x5c0   :  { %v7640_v45 = vpop.eup %7097 }
 0x5c1   :  { %v1947_v56 = vsel %vm1877_vm4, %v7640_v45, 0.0  ;;  %v1172_v5 = vrot.slane %v1164_v3, %v7433_v31  ;;  %v1188_v10 = vrot.slane %v1180_v4, %v7433_v31  ;;  %v1179_v15 = vrot.slane %v1165_v35, %v7433_v31 }
 0x5c2   :  { %v1195_v16 = vrot.slane %v1181_v36, %v7433_v31 }
 0x5c3   :  { %1948 = vadd.xlane.f32.xlu1 %v1947_v56  ;;  %v1196_v19 = vcombine.low %v1172_v5, %v1188_v10  ;;  %v1197_v20 = vcombine.high %v1172_v5, %v1188_v10 }
 0x5c4   :  { %v1198_v21 = vcombine.low %v1179_v15, %v1195_v16  ;;  %v1199_v22 = vcombine.high %v1179_v15, %v1195_v16 }
 0x5c5   :  { %6741 = vmatpush3.msra.mxu0 %v1196_v19  ;;  %6746 = vmatpush3.msra.mxu1 %v1197_v20 }
 0x5c6   :  { %6750 = vmatprep.subr.mxu0 %v7220_v8  ;;  %6755 = vmatprep.subr.mxu1 %v7220_v8 }
 0x5d4   :  { %986 = vrot.lane.b32.xlu1 %v7382_v54, %s7218_s28 }
 0x61c   :  { %v1940_v25 = vpop.xlane.xlu0 %1939 }
 0x620   :  { %v1931_v26 = vpop.xlane.xlu1 %1930  ;;  %v1928_v27 = vpop.xlane.xlu0 %1927 }
 0x621   :  { %7099 = vrcp.f32 %v1931_v26 }
 0x622   :  { %7101 = vrcp.f32 %v1928_v27 }
 0x628   :  { %v1946_v28 = vpop.xlane.xlu0 %1945 }
 0x62c   :  { %v1934_v29 = vpop.xlane.xlu0 %1933 }
 0x62d   :  { %7103 = vrcp.f32 %v1934_v29 }
 0x62e   :  { %v7100_v30 = vpop.eup %7099 }
 0x62f   :  { %v7102_v12 = vpop.eup %7101  ;;  %v1953_v13 = vmul.f32 %v7100_v30, %v7602_v9 }
 0x630   :  { %v1951_v32 = vmul.f32 %v7102_v12, %v7600_v6  ;;  %v993_v37 = vpop.permute.xlu0 %992 }
 0x631   :  { %6748 = vmatmul.mubr.msk.f32.vlgmr.msra.gmra.mxu1 %vm1877_vm4, %v1953_v13  ;;  %v1080_v41 = vcombine.low %v981_v23, %v993_v37  ;;  %v1081_v38 = vcombine.high %v981_v23, %v993_v37 }
 0x632   :  { %6743 = vmatmul.mubr.msk.f32.vlgmr.msra.gmra.mxu0 %vm1877_vm4, %v1951_v32  ;;  %6756 = vmatpush3.msra.mxu1 %v1199_v22 }
 0x633   :  { %6751 = vmatpush3.msra.mxu0 %v1198_v21  ;;  %6752 = vmatprep.mubr.msk.f32.mxu0 %vm7221_vm1, %v7220_v8  ;;  %v1095_v46 = vrot.slane %v1081_v38, %v7430_v24 }
 0x634   :  { %6757 = vmatprep.mubr.msk.f32.mxu1 %vm7221_vm1, %v7220_v8  ;;  %6760 = vmatprep.subr.mxu0 %v7220_v8 }
 0x635   :  { %6765 = vmatprep.subr.mxu1 %v7220_v8 }
 0x63a   :  { %v7104_v33 = vpop.eup %7103 }
 0x63b   :  { %v1955_v9 = vmul.f32 %v7104_v33, %v7612_v18  ;;  %v1088_v18 = vrot.slane %v1080_v41, %v7430_v24 }
 0x63d   :  { %6753 = vmatmul.mubr.msk.f32.vlgmr.msra.gmra.mxu0 %vm1877_vm4, %v1955_v9 }
 0x63e   :  { %6762 = vmatprep.mubr.msk.f32.mxu0 %vm7221_vm1, %v7220_v8 }
 0x644   :  { %v1937_v6 = vpop.xlane.xlu1 %1936 }
 0x645   :  { %7105 = vrcp.f32 %v1937_v6 }
 0x646   :  { %7107 = vrcp.f32 %v1940_v25 }
 0x648   :  { %v1943_v34 = vpop.xlane.xlu1 %1942 }
 0x649   :  { %7109 = vrcp.f32 %v1943_v34 }
 0x64a   :  { %7111 = vrcp.f32 %v1946_v28 }
 0x64c   :  { %v1949_v40 = vpop.xlane.xlu1 %1948 }
 0x64d   :  { %7113 = vrcp.f32 %v1949_v40 }
 0x650   :  { %v987_v42 = vpop.permute.xlu1 %986 }
 0x651   :  { %v1064_v7 = vcombine.low %v7382_v54, %v987_v42  ;;  %v1065_v43 = vcombine.high %v7382_v54, %v987_v42 }
 0x652   :  { %v7106_v44 = vpop.eup %7105 }
 0x653   :  { %v1072_v39 = vrot.slane %v1064_v7, %v7430_v24  ;;  %v1079_v48 = vrot.slane %v1065_v43, %v7430_v24  ;;  %v1957_v49 = vmul.f32 %v7106_v44, %v7622_v47  ;;  %v7108_v15 = vpop.eup %7107 }
 0x654   :  { %v1959_v27 = vmul.f32 %v7108_v15, %v7596_v57 }
 0x655   :  { %v1096_v51 = vcombine.low %v1072_v39, %v1088_v18  ;;  %v1097_v52 = vcombine.high %v1072_v39, %v1088_v18  ;;  %v1112_v53 = vcombine.low %v1079_v48, %v1095_v46  ;;  %v1113_v58 = vcombine.high %v1079_v48, %v1095_v46  ;;  %6758 = vmatmul.mubr.msk.f32.vlgmr.msra.gmra.mxu1 %vm1877_vm4, %v1957_v49 }
 0x656   :  { %6767 = vmatprep.mubr.msk.f32.mxu1 %vm7221_vm1, %v7220_v8  ;;  %v7110_v16 = vpop.eup %7109 }
 0x657   :  { %v1104_v54 = vrot.slane %v1096_v51, %v7433_v31  ;;  %v1111_v60 = vrot.slane %v1097_v52, %v7433_v31  ;;  %v1120_v59 = vrot.slane %v1112_v53, %v7433_v31  ;;  %v1127_v62 = vrot.slane %v1113_v58, %v7433_v31  ;;  %v7112_v23 = vpop.eup %7111 }
 0x658   :  { %v1961_v28 = vmul.f32 %v7110_v16, %v7632_v61  ;;  %v1963_v13 = vmul.f32 %v7112_v23, %v7608_v14  ;;  %v7019_v14 = vld [vmem:[%s8443_s2 + $0x18] sm:$0xff]   ;;  %v7020_v61 = vld [vmem:[%s8443_s2 + $0x10] sm:$0xff]  }
 0x659   :  { %v1200_v47 = vcombine.low %v1104_v54, %v1111_v60  ;;  %v6353_v63 = vcombine.high %v1104_v54, %v1111_v60  ;;  %v1216_v0 = vcombine.low %v1120_v59, %v1127_v62  ;;  %v6354_v1 = vcombine.high %v1120_v59, %v1127_v62 }
 0x65a   :  { %v7114_v29 = vpop.eup %7113 }
 0x65b   :  { %v1207_v2 = vrot.slane %v1200_v47, %v7430_v24  ;;  %v1215_v3 = vrot.slane %v6353_v63, %v7430_v24  ;;  %v1223_v4 = vrot.slane %v1216_v0, %v7430_v24  ;;  %v1231_v35 = vrot.slane %v6354_v1, %v7430_v24 }
 0x65c   :  { %v1965_v57 = vmul.f32 %v7114_v29, %v7640_v45 }
 0x65d   :  { %v1232_v36 = vcombine.low %v1207_v2, %v1215_v3  ;;  %v1248_v56 = vcombine.low %v1223_v4, %v1231_v35  ;;  %v1233_v5 = vcombine.high %v1207_v2, %v1215_v3  ;;  %v1249_v10 = vcombine.high %v1223_v4, %v1231_v35 }
 0x65f   :  { %v1240_v19 = vrot.slane %v1232_v36, %v7433_v31  ;;  %v1256_v20 = vrot.slane %v1248_v56, %v7433_v31  ;;  %v1247_v21 = vrot.slane %v1233_v5, %v7433_v31  ;;  %v1263_v22 = vrot.slane %v1249_v10, %v7433_v31 }
 0x661   :  { %v1264_v25 = vcombine.low %v1240_v19, %v1256_v20  ;;  %v1265_v26 = vcombine.high %v1240_v19, %v1256_v20  ;;  %v1266_v30 = vcombine.low %v1247_v21, %v1263_v22  ;;  %v1267_v12 = vcombine.high %v1247_v21, %v1263_v22 }
 0x663   :  { %6761 = vmatpush3.msra.mxu0 %v1264_v25  ;;  %6766 = vmatpush3.msra.mxu1 %v1265_v26 }
 0x664   :  { %6763 = vmatmul.mubr.msk.f32.vlgmr.msra.gmra.mxu0 %vm1877_vm4, %v1959_v27  ;;  %6768 = vmatmul.mubr.msk.f32.vlgmr.msra.gmra.mxu1 %vm1877_vm4, %v1961_v28 }
 0x665   :  { %6770 = vmatprep.subr.mxu0 %v7220_v8  ;;  %6775 = vmatprep.subr.mxu1 %v7220_v8 }
 0x666   :  { %6771 = vmatpush3.msra.mxu0 %v1266_v30  ;;  %6776 = vmatpush3.msra.mxu1 %v1267_v12 }
 0x667   :  { %6772 = vmatprep.mubr.msk.f32.mxu0 %vm7221_vm1, %v7220_v8  ;;  %6777 = vmatprep.mubr.msk.f32.mxu1 %vm7221_vm1, %v7220_v8 }
 0x668   :  { %6773 = vmatmul.mubr.msk.f32.vlgmr.msra.gmra.mxu0 %vm1877_vm4, %v1963_v13  ;;  %6778 = vmatmul.mubr.msk.f32.vlgmr.msra.gmra.mxu1 %vm1877_vm4, %v1965_v57 }
 0x669   :  { %6780 = vmatprep.subr.bf16.mxu0 %v7220_v8  ;;  %6788 = vmatprep.mubr.msk.bf16.mxu0 %vm7221_vm1, %v7220_v8 }
 0x66a   :  { %3042 = vmatprep.mubr.bf16.mxu1 %v7215_v11  ;;  %6781 = vmatpush3.bf16.msra.mxu0 %v7019_v14 }
 0x66b   :  { %6782 = vmatprep.subr.bf16.mxu0 %v7220_v8 }
 0x66e   :  { %6783 = vmatpush3.bf16.msra.mxu0 %v7020_v61 }
 0x66f   :  { %6784 = vmatprep.subr.bf16.mxu0 %v7220_v8 }
 0x6f1   :  { %v2108_v45 = vpop.f32.mrf.mxu1 }
 0x6f2   :  { %v2035_v32 = vpop.f32.mrf.mxu0 }
 0x6f3   :  { %v6749_v33 = vpop.f32.mrf.mxu1 }
 0x6f4   :  { %v6744_v9 = vpop.f32.mrf.mxu0 }
 0x6fd   :  { %v2181_v6 = vpop.f32.mrf.mxu0 }
 0x6fe   :  { %v2550_v37 = vcombine.low %v2035_v32, %v2181_v6  ;;  %v2551_v40 = vcombine.high %v2035_v32, %v2181_v6 }
 0x6ff   :  { %v6754_v34 = vpop.f32.mrf.mxu0 }
 0x700   :  { %v2558_v43 = vrot.slane %v2550_v37, %v7430_v24  ;;  %v2565_v44 = vrot.slane %v2551_v40, %v7430_v24 }
 0x715   :  { %v2254_v41 = vpop.f32.mrf.mxu1 }
 0x716   :  { %v2566_v38 = vcombine.low %v2108_v45, %v2254_v41  ;;  %v2567_v42 = vcombine.high %v2108_v45, %v2254_v41 }
 0x717   :  { %v6759_v7 = vpop.f32.mrf.mxu1 }
 0x718   :  { %v2574_v18 = vrot.slane %v2566_v38, %v7430_v24  ;;  %v2581_v46 = vrot.slane %v2567_v42, %v7430_v24  ;;  %v7021_v42 = vld [vmem:[%s8443_s2 + $0x8] sm:$0xff]  }
 0x719   :  { %6785 = vmatpush3.bf16.msra.mxu0 %v7021_v42  ;;  %v7026_v42 = vld [vmem:[%s8444_s3 + $0x20] ss:$8 sps:$4 sm:$0xff]  }
 0x71a   :  { %v2582_v39 = vcombine.low %v2558_v43, %v2574_v18  ;;  %v2583_v48 = vcombine.high %v2558_v43, %v2574_v18  ;;  %v2598_v49 = vcombine.low %v2565_v44, %v2581_v46  ;;  %v2599_v51 = vcombine.high %v2565_v44, %v2581_v46  ;;  %6786 = vmatprep.subr.bf16.mxu0 %v7220_v8 }
 0x71c   :  { %v2590_v52 = vrot.slane %v2582_v39, %v7433_v31  ;;  %v2597_v53 = vrot.slane %v2583_v48, %v7433_v31  ;;  %v2606_v58 = vrot.slane %v2598_v49, %v7433_v31  ;;  %v2613_v54 = vrot.slane %v2599_v51, %v7433_v31 }
 0x71e   :  { %v2686_v60 = vcombine.low %v2590_v52, %v2597_v53  ;;  %v6379_v59 = vcombine.high %v2590_v52, %v2597_v53  ;;  %v2702_v62 = vcombine.low %v2606_v58, %v2613_v54  ;;  %v6380_v47 = vcombine.high %v2606_v58, %v2613_v54 }
 0x720   :  { %v2693_v63 = vrot.slane %v2686_v60, %v7430_v24  ;;  %v2701_v0 = vrot.slane %v6379_v59, %v7430_v24  ;;  %v2709_v1 = vrot.slane %v2702_v62, %v7430_v24  ;;  %v2717_v2 = vrot.slane %v6380_v47, %v7430_v24  ;;  %v7022_v59 = vld [vmem:[%s8443_s2] sm:$0xff]  }
 0x721   :  { %6787 = vmatpush3.bf16.msra.mxu0 %v7022_v59 }
 0x722   :  { %v2718_v3 = vcombine.low %v2693_v63, %v2701_v0  ;;  %v2734_v4 = vcombine.low %v2709_v1, %v2717_v2  ;;  %v2719_v6 = vcombine.high %v2693_v63, %v2701_v0  ;;  %v2735_v34 = vcombine.high %v2709_v1, %v2717_v2  ;;  %6792 = vmatprep.subr.bf16.mxu0 %v7220_v8 }
 0x724   :  { %v2327_v35 = vpop.f32.mrf.mxu0  ;;  %v2400_v36 = vpop.f32.mrf.mxu1  ;;  %v7727_v56 = vrot.slane %v2718_v3, %v7433_v31  ;;  %v7730_v5 = vrot.slane %v2734_v4, %v7433_v31  ;;  %v2733_v46 = vrot.slane %v2719_v6, %v7433_v31  ;;  %v2749_v39 = vrot.slane %v2735_v34, %v7433_v31 }
 0x726   :  { %v6764_v10 = vpop.f32.mrf.mxu0  ;;  %v6769_v15 = vpop.f32.mrf.mxu1  ;;  %v2750_v16 = vcombine.low %v7727_v56, %v7730_v5  ;;  %v2752_v62 = vcombine.low %v2733_v46, %v2749_v39  ;;  %v2751_v63 = vcombine.high %v7727_v56, %v7730_v5  ;;  %v7179_v5 = vld [vmem:[%s8441_s0] sm:$0xff] }
 0x728   :  { %v2473_v19 = vpop.f32.mrf.mxu0  ;;  %v2546_v20 = vpop.f32.mrf.mxu1 }
 0x729   :  { %v2618_v21 = vcombine.low %v2327_v35, %v2473_v19  ;;  %v2619_v22 = vcombine.high %v2327_v35, %v2473_v19  ;;  %v2634_v23 = vcombine.low %v2400_v36, %v2546_v20  ;;  %v2635_v25 = vcombine.high %v2400_v36, %v2546_v20 }
 0x72a   :  { %v6774_v26 = vpop.f32.mrf.mxu0  ;;  %v6779_v27 = vpop.f32.mrf.mxu1  ;;  %v2753_v35 = vcombine.high %v2733_v46, %v2749_v39 }
 0x72b   :  { %v2626_v28 = vrot.slane %v2618_v21, %v7430_v24  ;;  %v2633_v29 = vrot.slane %v2619_v22, %v7430_v24  ;;  %v2642_v30 = vrot.slane %v2634_v23, %v7430_v24  ;;  %v2649_v12 = vrot.slane %v2635_v25, %v7430_v24 }
 0x72d   :  { %v2650_v13 = vcombine.low %v2626_v28, %v2642_v30  ;;  %v2651_v57 = vcombine.high %v2626_v28, %v2642_v30  ;;  %v2666_v14 = vcombine.low %v2633_v29, %v2649_v12  ;;  %v2667_v61 = vcombine.high %v2633_v29, %v2649_v12 }
 0x72f   :  { %v2658_v45 = vrot.slane %v2650_v13, %v7433_v31  ;;  %v2665_v32 = vrot.slane %v2651_v57, %v7433_v31  ;;  %v2674_v33 = vrot.slane %v2666_v14, %v7433_v31  ;;  %v2681_v9 = vrot.slane %v2667_v61, %v7433_v31 }
 0x731   :  { %v2754_v37 = vcombine.low %v2658_v45, %v2665_v32  ;;  %v6381_v40 = vcombine.high %v2658_v45, %v2665_v32  ;;  %v2770_v41 = vcombine.low %v2674_v33, %v2681_v9  ;;  %v6382_v38 = vcombine.high %v2674_v33, %v2681_v9  ;;  %v7180_v32 = vld [vmem:[%s8441_s0 + $0x8] sm:$0xff] }
 0x733   :  { %v2761_v7 = vrot.slane %v2754_v37, %v7430_v24  ;;  %v2769_v43 = vrot.slane %v6381_v40, %v7430_v24  ;;  %v2777_v44 = vrot.slane %v2770_v41, %v7430_v24  ;;  %v2785_v18 = vrot.slane %v6382_v38, %v7430_v24  ;;  %v7023_v40 = vld [vmem:[%s8444_s3 + $0x30] ss:$8 sps:$4 sm:$0xff]   ;;  %v7025_v41 = vld [vmem:[%s8444_s3 + $0x34] ss:$8 sps:$4 sm:$0xff]   ;;  %v7028_v38 = vld [vmem:[%s8444_s3 + $0x24] ss:$8 sps:$4 sm:$0xff]  }
 0x734   :  { %3018 = vmatprep.subr.bf16.mxu1 %v7025_v41 }
 0x735   :  { %v2787_v48 = vcombine.high %v2761_v7, %v2769_v43  ;;  %v2803_v49 = vcombine.high %v2777_v44, %v2785_v18  ;;  %v2786_v51 = vcombine.low %v2761_v7, %v2769_v43  ;;  %v2802_v52 = vcombine.low %v2777_v44, %v2785_v18  ;;  %3019 = vmatpush1.bf16.msra.mxu1 %v7023_v40  ;;  %v7031_v7 = vld [vmem:[%s8444_s3 + $0x14] ss:$8 sps:$4 sm:$0xff]   ;;  %v7029_v43 = vld [vmem:[%s8444_s3 + $0x10] ss:$8 sps:$4 sm:$0xff]   ;;  %v7034_v44 = vld [vmem:[%s8444_s3 + $0x4] ss:$8 sps:$4 sm:$0xff]  }
 0x736   :  { %3020 = vmatprep.subr.bf16.mxu1 %v7028_v38  ;;  %v7032_v18 = vld [vmem:[%s8444_s3] ss:$8 sps:$4 sm:$0xff]  }
 0x737   :  { %v2801_v53 = vrot.slane %v2787_v48, %v7433_v31  ;;  %v2817_v58 = vrot.slane %v2803_v49, %v7433_v31  ;;  %v2794_v54 = vrot.slane %v2786_v51, %v7433_v31  ;;  %v2810_v60 = vrot.slane %v2802_v52, %v7433_v31 }
 0x739   :  { %v2820_v47 = vcombine.low %v2801_v53, %v2817_v58  ;;  %v2819_v0 = vcombine.high %v2794_v54, %v2810_v60  ;;  %v2818_v1 = vcombine.low %v2794_v54, %v2810_v60  ;;  %v2821_v4 = vcombine.high %v2801_v53, %v2817_v58  ;;  %3021 = vmatpush1.bf16.msra.mxu1 %v7026_v42  ;;  %v6388_v60 = vld [vmem:[%s8447_s6] ss:$0 sm:$0xff] }
 0x73a   :  { %3022 = vmatprep.subr.bf16.mxu1 %v7031_v7 }
 0x73b   :  { %v6982_v2 = vpack.i.bf16 %v2820_v47, %v2752_v62  ;;  %v6977_v3 = vpack.i.bf16 %v2819_v0, %v2751_v63  ;;  %v6987_v36 = vpack.i.bf16 %v2821_v4, %v2753_v35  ;;  %v7035_v0 = vld [vmem:[%s8445_s4 + $0x38] sm:$0xff]   ;;  %v7040_v35 = vld [vmem:[%s8445_s4 + $0x10] sm:$0xff]  }
 0x73c   :  { %v7039_v4 = vld [vmem:[%s8445_s4 + $0x18] sm:$0xff]  }
 0x73d   :  { %6983 = vrot.lane.b32.xlu0 %v6982_v2, %s7224_s19  ;;  %6978 = vrot.lane.b32.xlu1 %v6977_v3, %s7225_s20  ;;  %v7037_v2 = vld [vmem:[%s8445_s4 + $0x28] sm:$0xff]   ;;  %v7038_v3 = vld [vmem:[%s8445_s4 + $0x20] sm:$0xff]  }
 0x73e   :  { %3023 = vmatpush1.bf16.msra.mxu1 %v7029_v43 }
 0x73f   :  { %3024 = vmatprep.subr.bf16.mxu1 %v7034_v44 }
 0x741   :  { %6988 = vrot.lane.b32.xlu1 %v6987_v36, %s7226_s21  ;;  %v7041_v36 = vld [vmem:[%s8445_s4 + $0x8] sm:$0xff]  }
 0x742   :  { %3025 = vmatpush1.bf16.msra.mxu1 %v7032_v18 }
 0x7af   :  { %v6984_v10 = vpop.permute.xlu0 %6983  ;;  %v6979_v15 = vpop.permute.xlu1 %6978 }
 0x7b0   :  { %v6981_v19 = vunpack.i.h.bf16 %v6979_v15  ;;  %v6980_v20 = vunpack.i.l.bf16 %v6979_v15  ;;  %v6986_v21 = vunpack.i.h.bf16 %v6984_v10  ;;  %v6985_v22 = vunpack.i.l.bf16 %v6984_v10  ;;  %v7042_v10 = vld [vmem:[%s8445_s4] sm:$0xff]   ;;  %v7858_v15 = vld [vmem:[%s8451_s10 + $0x38] sm:$0xff] }
 0x7b2   :  { %v2846_v23 = vsel %vm1268_vm3, %v2750_v16, %v6980_v20  ;;  %v2847_v25 = vsel %vm1268_vm3, %v2818_v1, %v6981_v19  ;;  %v7036_v1 = vld [vmem:[%s8445_s4 + $0x30] sm:$0xff]  }
 0x7b3   :  { %v6989_v26 = vpop.permute.xlu1 %6988  ;;  %v2849_v29 = vsel %vm2848_vm5, %v2846_v23, %v6985_v22  ;;  %v2850_v30 = vsel %vm2848_vm5, %v2847_v25, %v6986_v21 }
 0x7b4   :  { %v6991_v27 = vunpack.i.h.bf16 %v6989_v26  ;;  %v6990_v28 = vunpack.i.l.bf16 %v6989_v26 }
 0x7b6   :  { %v2852_v12 = vsel %vm2851_vm6, %v2849_v29, %v6990_v28  ;;  %v2853_v13 = vsel %vm2851_vm6, %v2850_v30, %v6991_v27 }
 0x7b7   :  { %v2854_v57 = vpack.c.bf16 %v2853_v13, %v2852_v12 }
 0x7b9   :  { %6789 = vmatmul.mubr.msk.bf16.vlgmr.msra.gmra.mxu0 %vm63_vm0, %v2854_v57 }
 0x7ba   :  { %6808 = vmatprep.mubr.msk.bf16.mxu0 %vm7221_vm1, %v7220_v8  ;;  %6793 = vmatpush3.bf16.msra.mxu0 %v7035_v0 }
 0x7bb   :  { %6794 = vmatprep.subr.bf16.mxu0 %v7220_v8 }
 0x7be   :  { %6795 = vmatpush3.bf16.msra.mxu0 %v7036_v1 }
 0x7bf   :  { %6796 = vmatprep.subr.bf16.mxu0 %v7220_v8 }
 0x7c2   :  { %6797 = vmatpush3.bf16.msra.mxu0 %v7037_v2 }
 0x7c3   :  { %6798 = vmatprep.subr.bf16.mxu0 %v7220_v8 }
 0x7c6   :  { %6799 = vmatpush3.bf16.msra.mxu0 %v7038_v3  ;;  %v6409_v3 = vld [vmem:[%s8446_s5 + $0x1] ss:$0 sm:$0xff] }
 0x7c7   :  { %6800 = vmatprep.subr.bf16.mxu0 %v7220_v8 }
 0x7ca   :  { %6801 = vmatpush3.bf16.msra.mxu0 %v7039_v4 }
 0x7cb   :  { %6802 = vmatprep.subr.bf16.mxu0 %v7220_v8 }
 0x7ce   :  { %6803 = vmatpush3.bf16.msra.mxu0 %v7040_v35 }
 0x7cf   :  { %6804 = vmatprep.subr.bf16.mxu0 %v7220_v8 }
 0x7d2   :  { %6805 = vmatpush3.bf16.msra.mxu0 %v7041_v36 }
 0x7d3   :  { %6806 = vmatprep.subr.bf16.mxu0 %v7220_v8 }
 0x7d6   :  { %6807 = vmatpush3.bf16.msra.mxu0 %v7042_v10 }
 0x7d7   :  { %6831 = vmatprep.subr.mxu0 %v7858_v15 }
 0x879   :  { %v2924_v56 = vpop.f32.mrf.mxu0 }
 0x87a   :  { %v7780_v16 = vadd.f32 %v7179_v5, %v2924_v56 }
 0x87b   :  { %v6790_v14 = vpop.f32.mrf.mxu0 }
 0x87c   :  { %v2934_v61 = vmul.f32 %v7780_v16, %v7780_v16 }
 0x87d   :  { %v2927_v45 = vpop.f32.mrf.mxu0 }
 0x87e   :  { %v7787_v33 = vadd.f32 %v7180_v32, %v2927_v45  ;;  %v2936_v9 = vsel %vm63_vm0, %v2934_v61, 0.0  ;;  %v7865_v61 = vld [vmem:[%s8451_s10 + $0x30] sm:$0xff]  ;;  %v7872_v45 = vld [vmem:[%s8451_s10 + $0x28] sm:$0xff]  ;;  %v7879_v32 = vld [vmem:[%s8451_s10 + $0x20] sm:$0xff] }
 0x87f   :  { %2937 = vadd.xlane.f32.xlu0 %v2936_v9  ;;  %v6791_v6 = vpop.f32.mrf.mxu0  ;;  %v7886_v9 = vld [vmem:[%s8451_s10 + $0x18] sm:$0xff] }
 0x880   :  { %v2935_v34 = vmul.f32 %v7787_v33, %v7787_v33  ;;  %v7893_v6 = vld [vmem:[%s8451_s10 + $0x10] sm:$0xff] }
 0x882   :  { %v2939_v37 = vsel %vm63_vm0, %v2935_v34, 0.0  ;;  %v7900_v34 = vld [vmem:[%s8451_s10 + $0x8] sm:$0xff] }
 0x883   :  { %2940 = vadd.xlane.f32.xlu1 %v2939_v37  ;;  %v7907_v37 = vld [vmem:[%s8451_s10] sm:$0xff] }
 0x908   :  { %v2938_v46 = vpop.xlane.xlu0 %2937 }
 0x909   :  { %v2942_v39 = vmul.f32 0.015625, %v2938_v46 }
 0x90b   :  { %v2944_v48 = vadd.f32 1e-06, %v2942_v39 }
 0x90c   :  { %v2941_v49 = vpop.xlane.xlu1 %2940 }
 0x90d   :  { %7115 = vrsqrt.f32 %v2944_v48  ;;  %v2943_v51 = vmul.f32 0.015625, %v2941_v49  ;;  %v7045_v48 = vld [vmem:[%s8442_s1 + $0x74] ss:$8 sps:$4 sm:$0xff]   ;;  %v7046_v49 = vld [vmem:[%s8442_s1 + $0x60] ss:$8 sps:$4 sm:$0xff]  }
 0x90e   :  { %3264 = vmatprep.subr.bf16.mxu1 %v7045_v48 }
 0x90f   :  { %v2945_v52 = vadd.f32 1e-06, %v2943_v51  ;;  %v7051_v51 = vld [vmem:[%s8442_s1 + $0x54] ss:$8 sps:$4 sm:$0xff]  }
 0x911   :  { %7117 = vrsqrt.f32 %v2945_v52  ;;  %v7049_v52 = vld [vmem:[%s8442_s1 + $0x50] ss:$8 sps:$4 sm:$0xff]  }
 0x91a   :  { %v7116_v53 = vpop.eup %7115 }
 0x91b   :  { %v2948_v58 = vmul.f32 %v7116_v53, %v7780_v16  ;;  %v7054_v53 = vld [vmem:[%s8442_s1 + $0x44] ss:$8 sps:$4 sm:$0xff]  }
 0x91d   :  { %v2956_v62 = vmul.f32 %v6388_v60, %v2948_v58  ;;  %v7052_v58 = vld [vmem:[%s8442_s1 + $0x40] ss:$8 sps:$4 sm:$0xff]  }
 0x91e   :  { %v7118_v54 = vpop.eup %7117 }
 0x91f   :  { %v2949_v59 = vmul.f32 %v7118_v54, %v7787_v33 }
 0x921   :  { %v2957_v47 = vmul.f32 %v6388_v60, %v2949_v59 }
 0x923   :  { %v2958_v63 = vpack.c.bf16 %v2957_v47, %v2956_v62 }
 0x925   :  { %6397 = vmatmul.mubr.msk.bf16.vlgmr.msra.gmra.mxu1 %vm63_vm0, %v2958_v63 }
 0x926   :  { %3288 = vmatprep.mubr.bf16.mxu1 %v7215_v11 }
 0x9e5   :  { %v3044_v19 = vpop.f32.mrf.mxu1 }
 0x9e6   :  { %v6398_v20 = vmul.f32 -1.442695, %v3044_v19 }
 0x9e7   :  { %v3046_v21 = vpop.f32.mrf.mxu1 }
 0x9e8   :  { %7119 = vpow2.f32 %v6398_v20 }
 0x9e9   :  { %v3048_v22 = vpop.f32.mrf.mxu1 }
 0x9ea   :  { %v6399_v23 = vmul.f32 -1.442695, %v3048_v22 }
 0x9eb   :  { %v3050_v57 = vpop.f32.mrf.mxu1 }
 0x9ec   :  { %7121 = vpow2.f32 %v6399_v23 }
 0x9f5   :  { %v7120_v25 = vpop.eup %7119 }
 0x9f6   :  { %v3059_v26 = vadd.f32 1.0, %v7120_v25 }
 0x9f8   :  { %7123 = vrcp.f32 %v3059_v26  ;;  %v7189_v26 = vld [vmem:[%s8449_s8 + $0x8] sm:$0xff] }
 0x9f9   :  { %v7122_v27 = vpop.eup %7121 }
 0x9fa   :  { %v3060_v28 = vadd.f32 1.0, %v7122_v27 }
 0x9fc   :  { %7125 = vrcp.f32 %v3060_v28  ;;  %v7190_v28 = vld [vmem:[%s8450_s9 + $0x8] sm:$0xff] }
 0xa05   :  { %v7124_v29 = vpop.eup %7123 }
 0xa06   :  { %v3065_v30 = vmul.f32 %v7124_v29, %v3044_v19 }
 0xa08   :  { %v3067_v56 = vmul.f32 %v3065_v30, %v3046_v21 }
 0xa09   :  { %v7126_v12 = vpop.eup %7125 }
 0xa0a   :  { %v3066_v13 = vmul.f32 %v7126_v12, %v3048_v22 }
 0xa0c   :  { %v3068_v5 = vmul.f32 %v3066_v13, %v3050_v57  ;;  %v7191_v57 = vld [vmem:[%s8450_s9] sm:$0xff] }
 0xa0e   :  { %v3069_v14 = vpack.c.bf16 %v3068_v5, %v3067_v56 }
 0xa10   :  { %6809 = vmatmul.mubr.bf16.vlgmr.msra.gmra.mxu0 %v3069_v14 }
 0xa11   :  { %6832 = vmatpush3.msra.mxu0 %v7858_v15 }
 0xa12   :  { %6833 = vmatprep.subr.mxu0 %v7865_v61 }
 0xa13   :  { %6834 = vmatpush3.msra.mxu0 %v7865_v61 }
 0xa14   :  { %6835 = vmatprep.subr.mxu0 %v7872_v45 }
 0xa15   :  { %6836 = vmatpush3.msra.mxu0 %v7872_v45 }
 0xa16   :  { %6837 = vmatprep.subr.mxu0 %v7879_v32 }
 0xa17   :  { %6838 = vmatpush3.msra.mxu0 %v7879_v32 }
 0xa18   :  { %6839 = vmatprep.subr.mxu0 %v7886_v9 }
 0xa19   :  { %6840 = vmatpush3.msra.mxu0 %v7886_v9 }
 0xa1a   :  { %6841 = vmatprep.subr.mxu0 %v7893_v6 }
 0xa1b   :  { %6842 = vmatpush3.msra.mxu0 %v7893_v6 }
 0xa1c   :  { %6843 = vmatprep.subr.mxu0 %v7900_v34 }
 0xa1d   :  { %6844 = vmatpush3.msra.mxu0 %v7900_v34 }
 0xa1e   :  { %6845 = vmatprep.subr.mxu0 %v7907_v37 }
 0xa1f   :  { %6846 = vmatpush3.msra.mxu0 %v7907_v37 }
 0xa20   :  { %6870 = vmatprep.subr.mxu0 %v7220_v8 }
 0xad0   :  { %v3168_v40 = vpop.f32.mrf.mxu0 }
 0xad1   :  { %v7913_v41 = vadd.f32 %v3168_v40, %v7780_v16  ;;  %v7043_v16 = vld [vmem:[%s8442_s1 + $0x70] ss:$8 sps:$4 sm:$0xff]  }
 0xad2   :  { %v6810_v38 = vpop.f32.mrf.mxu0  ;;  %3265 = vmatpush1.bf16.msra.mxu1 %v7043_v16 }
 0xad3   :  { %v3179_v42 = vmul.f32 %v7913_v41, %v7913_v41 }
 0xad4   :  { %v3171_v7 = vpop.f32.mrf.mxu0 }
 0xad5   :  { %v7918_v43 = vadd.f32 %v3171_v7, %v7787_v33  ;;  %v3181_v44 = vsel %vm63_vm0, %v3179_v42, 0.0  ;;  %v7048_v33 = vld [vmem:[%s8442_s1 + $0x64] ss:$8 sps:$4 sm:$0xff]  }
 0xad6   :  { %3182 = vadd.xlane.f32.xlu0 %v3181_v44  ;;  %v6811_v18 = vpop.f32.mrf.mxu0  ;;  %3266 = vmatprep.subr.bf16.mxu1 %v7048_v33 }
 0xad7   :  { %v3180_v46 = vmul.f32 %v7918_v43, %v7918_v43  ;;  %3267 = vmatpush1.bf16.msra.mxu1 %v7046_v49 }
 0xad8   :  { %3268 = vmatprep.subr.bf16.mxu1 %v7051_v51 }
 0xad9   :  { %v3184_v39 = vsel %vm63_vm0, %v3180_v46, 0.0 }
 0xada   :  { %3185 = vadd.xlane.f32.xlu0 %v3184_v39 }
 0xadb   :  { %3269 = vmatpush1.bf16.msra.mxu1 %v7049_v52 }
 0xadc   :  { %3270 = vmatprep.subr.bf16.mxu1 %v7054_v53 }
 0xadf   :  { %3271 = vmatpush1.bf16.msra.mxu1 %v7052_v58 }
 0xae0   :  { %6812 = vmatprep.subr.mxu1 %v7858_v15 }
 0xb5f   :  { %v3183_v54 = vpop.xlane.xlu0 %3182 }
 0xb60   :  { %v3187_v60 = vmul.f32 0.015625, %v3183_v54 }
 0xb62   :  { %v3189_v59 = vadd.f32 1e-06, %v3187_v60 }
 0xb63   :  { %v3186_v62 = vpop.xlane.xlu0 %3185 }
 0xb64   :  { %7127 = vrsqrt.f32 %v3189_v59  ;;  %v3188_v47 = vmul.f32 0.015625, %v3186_v62 }
 0xb66   :  { %v3190_v63 = vadd.f32 1e-06, %v3188_v47 }
 0xb68   :  { %7129 = vrsqrt.f32 %v3190_v63 }
 0xb71   :  { %v7128_v0 = vpop.eup %7127 }
 0xb72   :  { %v3193_v1 = vmul.f32 %v7128_v0, %v7913_v41 }
 0xb74   :  { %v3201_v35 = vmul.f32 %v6409_v3, %v3193_v1 }
 0xb75   :  { %v7130_v2 = vpop.eup %7129 }
 0xb76   :  { %v3194_v4 = vmul.f32 %v7130_v2, %v7918_v43 }
 0xb78   :  { %v3202_v36 = vmul.f32 %v6409_v3, %v3194_v4 }
 0xb7a   :  { %v3203_v10 = vpack.c.bf16 %v3202_v36, %v3201_v35 }
 0xb7c   :  { %6426 = vmatmul.mubr.msk.bf16.vlgmr.msra.gmra.mxu1 %vm63_vm0, %v3203_v10 }
 0xb7d   :  { %6813 = vmatpush3.msra.mxu1 %v7858_v15 }
 0xb7e   :  { %6814 = vmatprep.subr.mxu1 %v7865_v61 }
 0xb7f   :  { %6815 = vmatpush3.msra.mxu1 %v7865_v61 }
 0xb80   :  { %6816 = vmatprep.subr.mxu1 %v7872_v45 }
 0xb81   :  { %6817 = vmatpush3.msra.mxu1 %v7872_v45 }
 0xb82   :  { %6818 = vmatprep.subr.mxu1 %v7879_v32 }
 0xb83   :  { %6819 = vmatpush3.msra.mxu1 %v7879_v32 }
 0xb84   :  { %6820 = vmatprep.subr.mxu1 %v7886_v9 }
 0xb85   :  { %6821 = vmatpush3.msra.mxu1 %v7886_v9 }
 0xb86   :  { %6822 = vmatprep.subr.mxu1 %v7893_v6 }
 0xb87   :  { %6823 = vmatpush3.msra.mxu1 %v7893_v6 }
 0xb88   :  { %6824 = vmatprep.subr.mxu1 %v7900_v34 }
 0xb89   :  { %6825 = vmatpush3.msra.mxu1 %v7900_v34 }
 0xb8a   :  { %6826 = vmatprep.subr.mxu1 %v7907_v37 }
 0xb8b   :  { %6827 = vmatpush3.msra.mxu1 %v7907_v37 }
 0xb8c   :  { %6850 = vmatprep.subr.mxu1 %v7220_v8 }
 0xc3c   :  { %v3290_v15 = vpop.f32.mrf.mxu1 }
 0xc3d   :  { %3388 = vrot.lane.b32.xlu1 %v3290_v15, %s7216_s22  ;;  %6828 = vmatprep.mubr.msk.f32.mxu1 %vm63_vm0, %v3290_v15  ;;  %v3386_v14 = vmul.f32 %v3290_v15, %v7378_v50  ;;  %v7192_v50 = vld [vmem:[%s8449_s8] sm:$0xff] }
 0xc3e   :  { %v7973_v19 = vpop.f32.mrf.mxu1  ;;  %v3299_v40 = vmul.f32 %v7192_v50, %v3290_v15 }
 0xc40   :  { %v3294_v20 = vpop.f32.mrf.mxu1 }
 0xc41   :  { %3390 = vrot.lane.b32.xlu0 %v3294_v20, %s7216_s22  ;;  %6829 = vmatmul.mubr.msk.f32.vlgmr.msra.gmra.mxu1 %vm63_vm0, %v3294_v20  ;;  %v3300_v27 = vmul.f32 %v7189_v26, %v3294_v20  ;;  %v3387_v32 = vmul.f32 %v3294_v20, %v7384_v55 }
 0xc42   :  { %6852 = vmatprep.mubr.msk.f32.mxu1 %vm7221_vm1, %v7220_v8  ;;  %v7983_v23 = vpop.f32.mrf.mxu1 }
 0xcaf   :  { %v3389_v21 = vpop.permute.xlu1 %3388 }
 0xcb0   :  { %6847 = vmatprep.mubr.msk.f32.mxu0 %vm63_vm0, %v3389_v21 }
 0xcb3   :  { %v3391_v22 = vpop.permute.xlu0 %3390 }
 0xcb4   :  { %6848 = vmatmul.mubr.msk.f32.vlgmr.msra.gmra.mxu0 %vm63_vm0, %v3391_v22 }
 0xcb5   :  { %6872 = vmatprep.mubr.msk.f32.mxu0 %vm7221_vm1, %v7220_v8 }
 0xd01   :  { %v6830_v25 = vpop.f32.mrf.mxu1 }
 0xd02   :  { %v3383_v29 = vmul.f32 %v7190_v28, %v6830_v25 }
 0xd03   :  { %v3373_v34 = vpop.f32.mrf.mxu1 }
 0xd04   :  { %v7991_v30 = vadd.f32 %v3383_v29, %v3300_v27  ;;  %v3382_v37 = vmul.f32 %v7191_v57, %v3373_v34 }
 0xd06   :  { %v3384_v38 = vadd.f32 %v3382_v37, %v3299_v40 }
 0xd74   :  { %v6849_v12 = vpop.f32.mrf.mxu0 }
 0xd75   :  { %v3472_v5 = vmul.f32 %v7190_v28, %v6849_v12 }
 0xd76   :  { %v3462_v13 = vpop.f32.mrf.mxu0 }
 0xd77   :  { %v3471_v56 = vmul.f32 %v7191_v57, %v3462_v13 }
 0xd79   :  { %3475 = vrot.lane.b32.xlu1 %v3471_v56, %s7216_s22 }
 0xd7d   :  { %3477 = vrot.lane.b32.xlu1 %v3472_v5, %s7216_s22 }
 0xdeb   :  { %v3476_v61 = vpop.permute.xlu1 %3475 }
 0xdec   :  { %v3481_v45 = vadd.f32 %v3476_v61, %v3386_v14 }
 0xdee   :  { %3781 = vrot.lane.b32.xlu1 %v3481_v45, %s7218_s28  ;;  %3777 = vrot.lane.b32.xlu0 %v3481_v45, %s7217_s27 }
 0xdef   :  { %v3478_v9 = vpop.permute.xlu1 %3477 }
 0xdf0   :  { %v3482_v6 = vadd.f32 %v3478_v9, %v3387_v32 }
 0xdf2   :  { %3785 = vrot.lane.b32.xlu0 %v3481_v45, %s7219_s29  ;;  %3779 = vrot.lane.b32.xlu1 %v3482_v6, %s7217_s27 }
 0xdf6   :  { %3783 = vrot.lane.b32.xlu0 %v3482_v6, %s7218_s28  ;;  %3787 = vrot.lane.b32.xlu1 %v3482_v6, %s7219_s29 }
 0xdfa   :  { %3485 = vrot.lane.b32.xlu0 %v3384_v38, %s7217_s27 }
 0xdfe   :  { %3789 = vrot.lane.b32.xlu0 %v3481_v45, %s7216_s22 }
 0xe60   :  { %v3778_v55 = vpop.permute.xlu0 %3777  ;;  %v3782_v42 = vpop.permute.xlu1 %3781 }
 0xe61   :  { %3793 = vrot.lane.b32.xlu1 %v3778_v55, %s7216_s22  ;;  %3797 = vrot.lane.b32.xlu0 %v3782_v42, %s7216_s22 }
 0xe64   :  { %v3786_v7 = vpop.permute.xlu0 %3785  ;;  %v3780_v44 = vpop.permute.xlu1 %3779 }
 0xe65   :  { %3801 = vrot.lane.b32.xlu1 %v3786_v7, %s7216_s22  ;;  %3497 = vrot.lane.b32.xlu0 %v3384_v38, %s7219_s29 }
 0xe68   :  { %v3788_v18 = vpop.permute.xlu1 %3787  ;;  %v3784_v46 = vpop.permute.xlu0 %3783 }
 0xe69   :  { %3491 = vrot.lane.b32.xlu1 %v3384_v38, %s7218_s28  ;;  %3795 = vrot.lane.b32.xlu0 %v3780_v44, %s7216_s22 }
 0xe6c   :  { %v3486_v39 = vpop.permute.xlu0 %3485 }
 0xe6d   :  { %3791 = vrot.lane.b32.xlu1 %v3482_v6, %s7216_s22  ;;  %3803 = vrot.lane.b32.xlu0 %v3788_v18, %s7216_s22 }
 0xe70   :  { %v3790_v16 = vpop.permute.xlu0 %3789 }
 0xe71   :  { %3799 = vrot.lane.b32.xlu1 %v3784_v46, %s7216_s22  ;;  %3493 = vrot.lane.b32.xlu0 %v7991_v30, %s7218_s28 }
 0xe75   :  { %3487 = vrot.lane.b32.xlu1 %v7991_v30, %s7217_s27 }
 0xe79   :  { %3499 = vrot.lane.b32.xlu1 %v7991_v30, %s7219_s29 }
 0xed3   :  { %v3798_v48 = vpop.permute.xlu0 %3797  ;;  %v3794_v33 = vpop.permute.xlu1 %3793 }
 0xed4   :  { %v3813_v49 = vcombine.low %v3790_v16, %v3798_v48  ;;  %v3814_v51 = vcombine.high %v3790_v16, %v3798_v48 }
 0xed6   :  { %v3821_v60 = vrot.slane %v3813_v49, %v7430_v24  ;;  %v3828_v59 = vrot.slane %v3814_v51, %v7430_v24 }
 0xed7   :  { %v3498_v52 = vpop.permute.xlu0 %3497  ;;  %v3802_v53 = vpop.permute.xlu1 %3801 }
 0xed8   :  { %v3829_v58 = vcombine.low %v3794_v33, %v3802_v53  ;;  %v3830_v54 = vcombine.high %v3794_v33, %v3802_v53  ;;  %v3519_v63 = vcombine.low %v3486_v39, %v3498_v52  ;;  %v3520_v0 = vcombine.high %v3486_v39, %v3498_v52 }
 0xeda   :  { %v3837_v62 = vrot.slane %v3829_v58, %v7430_v24  ;;  %v3844_v47 = vrot.slane %v3830_v54, %v7430_v24  ;;  %v3527_v26 = vrot.slane %v3519_v63, %v7430_v24  ;;  %v3534_v27 = vrot.slane %v3520_v0, %v7430_v24 }
 0xedb   :  { %v3796_v1 = vpop.permute.xlu0 %3795  ;;  %v3492_v2 = vpop.permute.xlu1 %3491 }
 0xedc   :  { %v3845_v3 = vcombine.low %v3821_v60, %v3837_v62  ;;  %v3846_v4 = vcombine.high %v3821_v60, %v3837_v62  ;;  %v3861_v35 = vcombine.low %v3828_v59, %v3844_v47  ;;  %v3862_v36 = vcombine.high %v3828_v59, %v3844_v47 }
 0xedd   :  { %v3503_v10 = vcombine.low %v3384_v38, %v3492_v2  ;;  %v3504_v15 = vcombine.high %v3384_v38, %v3492_v2 }
 0xede   :  { %v3853_v20 = vrot.slane %v3845_v3, %v7433_v31  ;;  %v3860_v21 = vrot.slane %v3846_v4, %v7433_v31  ;;  %v3869_v22 = vrot.slane %v3861_v35, %v7433_v31  ;;  %v3876_v25 = vrot.slane %v3862_v36, %v7433_v31 }
 0xedf   :  { %v3511_v28 = vrot.slane %v3503_v10, %v7430_v24  ;;  %v3518_v29 = vrot.slane %v3504_v15, %v7430_v24  ;;  %v3804_v12 = vpop.permute.xlu0 %3803  ;;  %v3792_v13 = vpop.permute.xlu1 %3791 }
 0xee0   :  { %v3949_v57 = vcombine.low %v3853_v20, %v3860_v21  ;;  %v6435_v56 = vcombine.high %v3853_v20, %v3860_v21  ;;  %v3965_v5 = vcombine.low %v3869_v22, %v3876_v25  ;;  %v6436_v14 = vcombine.high %v3869_v22, %v3876_v25 }
 0xee1   :  { %v3535_v61 = vcombine.low %v3511_v28, %v3527_v26  ;;  %v3536_v45 = vcombine.high %v3511_v28, %v3527_v26  ;;  %v3551_v32 = vcombine.low %v3518_v29, %v3534_v27  ;;  %v3552_v9 = vcombine.high %v3518_v29, %v3534_v27 }
 0xee2   :  { %v3956_v6 = vrot.slane %v3949_v57, %v7430_v24  ;;  %v3964_v34 = vrot.slane %v6435_v56, %v7430_v24  ;;  %v3972_v37 = vrot.slane %v3965_v5, %v7430_v24  ;;  %v3980_v50 = vrot.slane %v6436_v14, %v7430_v24 }
 0xee3   :  { %v3543_v40 = vrot.slane %v3535_v61, %v7433_v31  ;;  %v3550_v38 = vrot.slane %v3536_v45, %v7433_v31  ;;  %v3559_v55 = vrot.slane %v3551_v32, %v7433_v31  ;;  %v3566_v42 = vrot.slane %v3552_v9, %v7433_v31  ;;  %v3494_v7 = vpop.permute.xlu0 %3493  ;;  %v3800_v44 = vpop.permute.xlu1 %3799 }
 0xee4   :  { %v3981_v18 = vcombine.low %v3956_v6, %v3964_v34  ;;  %v3982_v46 = vcombine.high %v3956_v6, %v3964_v34  ;;  %v3997_v39 = vcombine.low %v3972_v37, %v3980_v50  ;;  %v3998_v16 = vcombine.high %v3972_v37, %v3980_v50 }
 0xee5   :  { %v3639_v48 = vcombine.low %v3543_v40, %v3550_v38  ;;  %v6431_v33 = vcombine.high %v3543_v40, %v3550_v38  ;;  %v3655_v49 = vcombine.low %v3559_v55, %v3566_v42  ;;  %v6432_v51 = vcombine.high %v3559_v55, %v3566_v42 }
 0xee6   :  { %v3897_v52 = vcombine.low %v3796_v1, %v3804_v12  ;;  %v3898_v53 = vcombine.high %v3796_v1, %v3804_v12  ;;  %v3571_v58 = vcombine.low %v7991_v30, %v3494_v7  ;;  %v3572_v54 = vcombine.high %v7991_v30, %v3494_v7 }
 0xee7   :  { %v3646_v60 = vrot.slane %v3639_v48, %v7430_v24  ;;  %v3654_v59 = vrot.slane %v6431_v33, %v7430_v24  ;;  %v8051_v62 = vrot.slane %v3655_v49, %v7430_v24  ;;  %v8054_v47 = vrot.slane %v6432_v51, %v7430_v24  ;;  %v3488_v63 = vpop.permute.xlu1 %3487 }
 0xee8   :  { %v3905_v0 = vrot.slane %v3897_v52, %v7430_v24  ;;  %v3912_v2 = vrot.slane %v3898_v53, %v7430_v24  ;;  %v3579_v1 = vrot.slane %v3571_v58, %v7430_v24  ;;  %v3586_v3 = vrot.slane %v3572_v54, %v7430_v24 }
 0xee9   :  { %v3671_v30 = vcombine.low %v3646_v60, %v3654_v59  ;;  %v3672_v4 = vcombine.high %v3646_v60, %v3654_v59  ;;  %v3687_v35 = vcombine.low %v8051_v62, %v8054_v47  ;;  %v3688_v36 = vcombine.high %v8051_v62, %v8054_v47 }
 0xeea   :  { %v3881_v10 = vcombine.low %v3792_v13, %v3800_v44  ;;  %v3882_v15 = vcombine.high %v3792_v13, %v3800_v44  ;;  %v3989_v20 = vrot.slane %v3981_v18, %v7433_v31  ;;  %v4005_v21 = vrot.slane %v3997_v39, %v7433_v31 }
 0xeeb   :  { %v3500_v22 = vpop.permute.xlu1 %3499  ;;  %v3679_v25 = vrot.slane %v3671_v30, %v7433_v31  ;;  %v3695_v26 = vrot.slane %v3687_v35, %v7433_v31  ;;  %v8069_v27 = vrot.slane %v3982_v46, %v7433_v31  ;;  %v8072_v28 = vrot.slane %v3998_v16, %v7433_v31 }
 0xeec   :  { %v3889_v29 = vrot.slane %v3881_v10, %v7430_v24  ;;  %v3896_v12 = vrot.slane %v3882_v15, %v7430_v24  ;;  %v4013_v13 = vcombine.low %v3989_v20, %v4005_v21  ;;  %v3587_v57 = vcombine.low %v3488_v63, %v3500_v22 }
 0xeed   :  { %v3588_v56 = vcombine.high %v3488_v63, %v3500_v22  ;;  %v3703_v5 = vcombine.low %v3679_v25, %v3695_v26  ;;  %v4014_v14 = vcombine.high %v3989_v20, %v4005_v21  ;;  %v3704_v61 = vcombine.high %v3679_v25, %v3695_v26 }
 0xeee   :  { %v3913_v45 = vcombine.low %v3889_v29, %v3905_v0  ;;  %v3914_v32 = vcombine.high %v3889_v29, %v3905_v0  ;;  %v3929_v9 = vcombine.low %v3896_v12, %v3912_v2  ;;  %v3930_v6 = vcombine.high %v3896_v12, %v3912_v2  ;;  %6851 = vmatpush3.xpose.msk.msra.mxu1 %vm1268_vm3, %v4013_v13 }
 0xeef   :  { %v3595_v34 = vrot.slane %v3587_v57, %v7430_v24  ;;  %v3602_v37 = vrot.slane %v3588_v56, %v7430_v24  ;;  %6855 = vmatprep.subr.mxu1 %v7220_v8  ;;  %v4015_v50 = vcombine.low %v8069_v27, %v8072_v28  ;;  %v8083_v40 = vrot.slane %v3672_v4, %v7433_v31 }
 0xef0   :  { %v3921_v38 = vrot.slane %v3913_v45, %v7433_v31  ;;  %v3928_v55 = vrot.slane %v3914_v32, %v7433_v31  ;;  %v3937_v42 = vrot.slane %v3929_v9, %v7433_v31  ;;  %v3944_v7 = vrot.slane %v3930_v6, %v7433_v31 }
 0xef1   :  { %v3603_v44 = vcombine.low %v3579_v1, %v3595_v34  ;;  %v3604_v18 = vcombine.high %v3579_v1, %v3595_v34  ;;  %v3619_v46 = vcombine.low %v3586_v3, %v3602_v37  ;;  %v3620_v39 = vcombine.high %v3586_v3, %v3602_v37  ;;  %6853 = vmatmul.mubr.msk.f32.vlgmr.msra.gmra.mxu1 %vm1268_vm3, %v3703_v5 }
 0xef2   :  { %v4017_v16 = vcombine.low %v3921_v38, %v3928_v55  ;;  %v6437_v48 = vcombine.high %v3921_v38, %v3928_v55  ;;  %v4033_v33 = vcombine.low %v3937_v42, %v3944_v7  ;;  %v6438_v49 = vcombine.high %v3937_v42, %v3944_v7  ;;  %6856 = vmatpush3.xpose.msk.msra.mxu1 %vm1268_vm3, %v4014_v14 }
 0xef3   :  { %v3611_v51 = vrot.slane %v3603_v44, %v7433_v31  ;;  %v3618_v52 = vrot.slane %v3604_v18, %v7433_v31  ;;  %v3627_v53 = vrot.slane %v3619_v46, %v7433_v31  ;;  %v3634_v58 = vrot.slane %v3620_v39, %v7433_v31  ;;  %6857 = vmatprep.mubr.msk.f32.mxu1 %vm7221_vm1, %v7220_v8 }
 0xef4   :  { %v4024_v54 = vrot.slane %v4017_v16, %v7430_v24  ;;  %v4032_v60 = vrot.slane %v6437_v48, %v7430_v24  ;;  %v4040_v59 = vrot.slane %v4033_v33, %v7430_v24  ;;  %v4048_v63 = vrot.slane %v6438_v49, %v7430_v24  ;;  %6860 = vmatprep.subr.mxu1 %v7220_v8 }
 0xef5   :  { %v3707_v0 = vcombine.low %v3611_v51, %v3618_v52  ;;  %v6433_v2 = vcombine.high %v3611_v51, %v3618_v52  ;;  %v3723_v1 = vcombine.low %v3627_v53, %v3634_v58  ;;  %v6434_v3 = vcombine.high %v3627_v53, %v3634_v58  ;;  %6858 = vmatmul.mubr.msk.f32.vlgmr.msra.gmra.mxu1 %vm1268_vm3, %v3704_v61 }
 0xef6   :  { %v4049_v30 = vcombine.low %v4024_v54, %v4032_v60  ;;  %v4050_v4 = vcombine.high %v4024_v54, %v4032_v60  ;;  %v4065_v35 = vcombine.low %v4040_v59, %v4048_v63  ;;  %v4066_v10 = vcombine.high %v4040_v59, %v4048_v63  ;;  %6861 = vmatpush3.xpose.msk.msra.mxu1 %vm1268_vm3, %v4015_v50 }
 0xef7   :  { %v3714_v15 = vrot.slane %v3707_v0, %v7430_v24  ;;  %v3722_v20 = vrot.slane %v6433_v2, %v7430_v24  ;;  %v3730_v21 = vrot.slane %v3723_v1, %v7430_v24  ;;  %v3738_v22 = vrot.slane %v6434_v3, %v7430_v24  ;;  %6862 = vmatprep.mubr.msk.f32.mxu1 %vm7221_vm1, %v7220_v8 }
 0xef8   :  { %6865 = vmatprep.subr.mxu1 %v7220_v8  ;;  %v3702_v25 = vrot.slane %v3688_v36, %v7433_v31  ;;  %v4057_v26 = vrot.slane %v4049_v30, %v7433_v31  ;;  %v4073_v29 = vrot.slane %v4065_v35, %v7433_v31  ;;  %v4016_v14 = vcombine.high %v8069_v27, %v8072_v28 }
 0xef9   :  { %v3739_v12 = vcombine.low %v3714_v15, %v3722_v20  ;;  %v3740_v13 = vcombine.high %v3714_v15, %v3722_v20  ;;  %v3755_v57 = vcombine.low %v3730_v21, %v3738_v22  ;;  %v3756_v56 = vcombine.high %v3730_v21, %v3738_v22 }
 0xefa   :  { %v3705_v5 = vcombine.low %v8083_v40, %v3702_v25  ;;  %v4081_v61 = vcombine.low %v4057_v26, %v4073_v29  ;;  %v4064_v62 = vrot.slane %v4050_v4, %v7433_v31  ;;  %v4080_v47 = vrot.slane %v4066_v10, %v7433_v31 }
 0xefb   :  { %v3747_v45 = vrot.slane %v3739_v12, %v7433_v31  ;;  %v3763_v32 = vrot.slane %v3755_v57, %v7433_v31  ;;  %v3754_v27 = vrot.slane %v3740_v13, %v7433_v31  ;;  %v3770_v28 = vrot.slane %v3756_v56, %v7433_v31 }
 0xefc   :  { %6863 = vmatmul.mubr.msk.f32.vlgmr.msra.gmra.mxu1 %vm1268_vm3, %v3705_v5  ;;  %6871 = vmatpush3.xpose.msk.msra.mxu0 %vm1268_vm3, %v4081_v61  ;;  %v3706_v9 = vcombine.high %v8083_v40, %v3702_v25  ;;  %v4083_v6 = vcombine.low %v4064_v62, %v4080_v47  ;;  %v4082_v34 = vcombine.high %v4057_v26, %v4073_v29 }
 0xefd   :  { %6866 = vmatpush3.xpose.msk.msra.mxu1 %vm1268_vm3, %v4016_v14  ;;  %6867 = vmatprep.mubr.msk.f32.mxu1 %vm7221_vm1, %v7220_v8  ;;  %v3771_v36 = vcombine.low %v3747_v45, %v3763_v32  ;;  %v3772_v37 = vcombine.high %v3747_v45, %v3763_v32  ;;  %v3773_v50 = vcombine.low %v3754_v27, %v3770_v28 }
 0xefe   :  { %6875 = vmatprep.subr.mxu1 %v7220_v8  ;;  %6880 = vmatprep.subr.mxu0 %v7220_v8  ;;  %v4084_v40 = vcombine.high %v4064_v62, %v4080_v47  ;;  %v3774_v38 = vcombine.high %v3754_v27, %v3770_v28 }
 0xeff   :  { %6873 = vmatmul.mubr.msk.f32.vlgmr.msra.gmra.mxu0 %vm1268_vm3, %v3771_v36 }
 0xf00   :  { %6868 = vmatmul.mubr.msk.f32.vlgmr.msra.gmra.mxu1 %vm1268_vm3, %v3706_v9  ;;  %6881 = vmatpush3.xpose.msk.msra.mxu0 %vm1268_vm3, %v4083_v6 }
 0xf01   :  { %6876 = vmatpush3.xpose.msk.msra.mxu1 %vm1268_vm3, %v4082_v34  ;;  %6877 = vmatprep.mubr.msk.f32.mxu1 %vm7221_vm1, %v7220_v8 }
 0xf02   :  { %6885 = vmatprep.subr.mxu1 %v7220_v8  ;;  %6882 = vmatprep.mubr.msk.f32.mxu0 %vm7221_vm1, %v7220_v8 }
 0xf03   :  { %6883 = vmatmul.mubr.msk.f32.vlgmr.msra.gmra.mxu0 %vm1268_vm3, %v3773_v50  ;;  %6890 = vmatprep.subr.mxu0 %v7220_v8 }
 0xf04   :  { %6878 = vmatmul.mubr.msk.f32.vlgmr.msra.gmra.mxu1 %vm1268_vm3, %v3772_v37  ;;  %6892 = vmatprep.mubr.msk.f32.mxu0 %vm7221_vm1, %v7220_v8 }
 0xf05   :  { %6886 = vmatpush3.xpose.msk.msra.mxu1 %vm1268_vm3, %v4084_v40  ;;  %6887 = vmatprep.mubr.msk.f32.mxu1 %vm7221_vm1, %v7220_v8 }
 0xf06   :  { %6895 = vmatprep.subr.mxu1 %v7220_v8 }
 0xf08   :  { %6888 = vmatmul.mubr.msk.f32.vlgmr.msra.gmra.mxu1 %vm1268_vm3, %v3774_v38 }
 0xf09   :  { %6897 = vmatprep.mubr.msk.f32.mxu1 %vm7221_vm1, %v7220_v8 }
 0xfb1   :  { %v4449_v55 = vpop.f32.mrf.mxu1 }
 0xfb2   :  { %v4450_v42 = vadd.f32 %v4449_v55, %v7570_v17 }
 0xfb3   :  { %v6854_v7 = vpop.f32.mrf.mxu1 }
 0xfb4   :  { %v4985_v44 = vsel %vm1877_vm4, %v4450_v42, -inf }
 0xfb5   :  { %4986 = vmax.xlane.f32.xlu0 %v4985_v44  ;;  %v4525_v18 = vpop.f32.mrf.mxu1 }
 0xfb6   :  { %v4526_v30 = vadd.f32 %v4525_v18, %v7570_v17 }
 0xfb7   :  { %v6859_v46 = vpop.f32.mrf.mxu1 }
 0xfb8   :  { %v4988_v22 = vsel %vm1877_vm4, %v4526_v30, -inf }
 0xfbc   :  { %v4601_v39 = vpop.f32.mrf.mxu1 }
 0xfbd   :  { %v4602_v16 = vadd.f32 %v4601_v39, %v7570_v17 }
 0xfbe   :  { %v6864_v48 = vpop.f32.mrf.mxu1 }
 0xfbf   :  { %v4991_v33 = vsel %vm1877_vm4, %v4602_v16, -inf  ;;  %v4753_v49 = vpop.f32.mrf.mxu0 }
 0xfc0   :  { %4992 = vmax.xlane.f32.xlu0 %v4991_v33  ;;  %v4677_v51 = vpop.f32.mrf.mxu1  ;;  %v4754_v52 = vadd.f32 %v4753_v49, %v7570_v17 }
 0xfc1   :  { %v4678_v53 = vadd.f32 %v4677_v51, %v7570_v17  ;;  %v6874_v58 = vpop.f32.mrf.mxu0 }
 0xfc2   :  { %v6869_v54 = vpop.f32.mrf.mxu1  ;;  %v4997_v60 = vsel %vm1877_vm4, %v4754_v52, -inf }
 0xfc3   :  { %v4994_v59 = vsel %vm1877_vm4, %v4678_v53, -inf  ;;  %4998 = vmax.xlane.f32.xlu1 %v4997_v60  ;;  %v4905_v63 = vpop.f32.mrf.mxu0 }
 0xfc4   :  { %4995 = vmax.xlane.f32.xlu0 %v4994_v59  ;;  %v4829_v0 = vpop.f32.mrf.mxu1  ;;  %v4906_v2 = vadd.f32 %v4905_v63, %v7570_v17 }
 0xfc5   :  { %v4830_v1 = vadd.f32 %v4829_v0, %v7570_v17  ;;  %v6884_v3 = vpop.f32.mrf.mxu0 }
 0xfc6   :  { %v6879_v4 = vpop.f32.mrf.mxu1  ;;  %v5003_v35 = vsel %vm1877_vm4, %v4906_v2, -inf }
 0xfc7   :  { %v5000_v10 = vsel %vm1877_vm4, %v4830_v1, -inf  ;;  %5004 = vmax.xlane.f32.xlu1 %v5003_v35 }
 0xfc8   :  { %5001 = vmax.xlane.f32.xlu0 %v5000_v10  ;;  %v4981_v15 = vpop.f32.mrf.mxu1 }
 0xfc9   :  { %v4982_v20 = vadd.f32 %v4981_v15, %v7570_v17 }
 0xfca   :  { %v6889_v21 = vpop.f32.mrf.mxu1 }
 0xfcb   :  { %v5006_v25 = vsel %vm1877_vm4, %v4982_v20, -inf  ;;  %4989 = vmax.xlane.f32.xlu1 %v4988_v22 }
 0xfcc   :  { %5007 = vmax.xlane.f32.xlu0 %v5006_v25 }
 0xfdc   :  { %4087 = vrot.lane.b32.xlu1 %v7973_v19, %s7217_s27 }
 0xfe0   :  { %4099 = vrot.lane.b32.xlu1 %v7973_v19, %s7219_s29 }
 0xfe2   :  { %4093 = vrot.lane.b32.xlu0 %v7973_v19, %s7218_s28 }
0x103e   :  { %v4987_v26 = vpop.xlane.xlu0 %4986 }
0x103f   :  { %v5009_v12 = vsub.f32 %v4450_v42, %v4987_v26 }
0x1041   :  { %v5017_v56 = vmul.f32 1.442695, %v5009_v12 }
0x1049   :  { %v4993_v29 = vpop.xlane.xlu0 %4992 }
0x104a   :  { %v5011_v32 = vsub.f32 %v4602_v16, %v4993_v29 }
0x104c   :  { %v4999_v17 = vpop.xlane.xlu1 %4998  ;;  %v5021_v9 = vmul.f32 1.442695, %v5011_v32 }
0x104d   :  { %v4996_v13 = vpop.xlane.xlu0 %4995  ;;  %v5013_v57 = vsub.f32 %v4754_v52, %v4999_v17 }
0x104e   :  { %v5012_v47 = vsub.f32 %v4678_v53, %v4996_v13 }
0x104f   :  { %v5025_v5 = vmul.f32 1.442695, %v5013_v57 }
0x1050   :  { %v5005_v14 = vpop.xlane.xlu1 %5004  ;;  %v5023_v34 = vmul.f32 1.442695, %v5012_v47 }
0x1051   :  { %v5002_v61 = vpop.xlane.xlu0 %5001  ;;  %7131 = vpow2.f32 %v5025_v5  ;;  %v5015_v45 = vsub.f32 %v4906_v2, %v5005_v14 }
0x1052   :  { %7133 = vpow2.f32 %v5017_v56  ;;  %v5014_v37 = vsub.f32 %v4830_v1, %v5002_v61 }
0x1053   :  { %v5029_v62 = vmul.f32 1.442695, %v5015_v45 }
0x1054   :  { %v4990_v36 = vpop.xlane.xlu1 %4989  ;;  %v5027_v42 = vmul.f32 1.442695, %v5014_v37 }
0x1055   :  { %v5008_v27 = vpop.xlane.xlu0 %5007  ;;  %v5010_v28 = vsub.f32 %v4526_v30, %v4990_v36  ;;  %7135 = vpow2.f32 %v5029_v62 }
0x1056   :  { %v5016_v7 = vsub.f32 %v4982_v20, %v5008_v27 }
0x1057   :  { %v5019_v6 = vmul.f32 1.442695, %v5010_v28 }
0x1058   :  { %v4088_v50 = vpop.permute.xlu1 %4087  ;;  %v5031_v52 = vmul.f32 1.442695, %v5016_v7 }
0x1059   :  { %v4094_v40 = vpop.permute.xlu0 %4093  ;;  %7137 = vpow2.f32 %v5019_v6 }
0x105a   :  { %7139 = vpow2.f32 %v5021_v9  ;;  %v4105_v38 = vcombine.low %v7973_v19, %v4094_v40  ;;  %v4106_v55 = vcombine.high %v7973_v19, %v4094_v40 }
0x105b   :  { %7141 = vpow2.f32 %v5023_v34 }
0x105c   :  { %v4100_v44 = vpop.permute.xlu1 %4099  ;;  %v4113_v16 = vrot.slane %v4105_v38, %v7430_v24  ;;  %v4120_v33 = vrot.slane %v4106_v55, %v7430_v24  ;;  %7143 = vpow2.f32 %v5027_v42 }
0x105d   :  { %v4121_v18 = vcombine.low %v4088_v50, %v4100_v44  ;;  %v4122_v46 = vcombine.high %v4088_v50, %v4100_v44  ;;  %7145 = vpow2.f32 %v5031_v52 }
0x105e   :  { %v8179_v39 = vpop.eup %7131 }
0x105f   :  { %v8182_v48 = vpop.eup %7133  ;;  %v4129_v49 = vrot.slane %v4121_v18, %v7430_v24  ;;  %v4136_v51 = vrot.slane %v4122_v46, %v7430_v24  ;;  %v5045_v19 = vsel %vm1877_vm4, %v8179_v39, 0.0 }
0x1060   :  { %5046 = vadd.xlane.f32.xlu1 %v5045_v19  ;;  %v5033_v59 = vsel %vm1877_vm4, %v8182_v48, 0.0 }
0x1061   :  { %v4137_v53 = vcombine.low %v4113_v16, %v4129_v49  ;;  %v4138_v58 = vcombine.high %v4113_v16, %v4129_v49  ;;  %v4153_v54 = vcombine.low %v4120_v33, %v4136_v51  ;;  %v4154_v60 = vcombine.high %v4120_v33, %v4136_v51 }
0x1062   :  { %v8191_v63 = vpop.eup %7135 }
0x1063   :  { %v4145_v0 = vrot.slane %v4137_v53, %v7433_v31  ;;  %v4152_v2 = vrot.slane %v4138_v58, %v7433_v31  ;;  %v4161_v1 = vrot.slane %v4153_v54, %v7433_v31  ;;  %v4168_v3 = vrot.slane %v4154_v60, %v7433_v31 }
0x1064   :  { %5034 = vadd.xlane.f32.xlu1 %v5033_v59  ;;  %v5051_v20 = vsel %vm1877_vm4, %v8191_v63, 0.0 }
0x1065   :  { %v4241_v30 = vcombine.low %v4145_v0, %v4152_v2  ;;  %v6439_v4 = vcombine.high %v4145_v0, %v4152_v2  ;;  %v4257_v35 = vcombine.low %v4161_v1, %v4168_v3  ;;  %v6440_v10 = vcombine.high %v4161_v1, %v4168_v3 }
0x1066   :  { %v7138_v15 = vpop.eup %7137 }
0x1067   :  { %v8199_v21 = vpop.eup %7139  ;;  %v4248_v22 = vrot.slane %v4241_v30, %v7430_v24  ;;  %v4256_v25 = vrot.slane %v6439_v4, %v7430_v24  ;;  %v4264_v26 = vrot.slane %v4257_v35, %v7430_v24  ;;  %v4272_v29 = vrot.slane %v6440_v10, %v7430_v24 }
0x1068   :  { %5052 = vadd.xlane.f32.xlu1 %v5051_v20  ;;  %v5036_v12 = vsel %vm1877_vm4, %v7138_v15, 0.0  ;;  %v8206_v17 = vpop.eup %7141  ;;  %v5039_v14 = vsel %vm1877_vm4, %v8199_v21, 0.0 }
0x1069   :  { %5037 = vadd.xlane.f32.xlu0 %v5036_v12  ;;  %v4273_v13 = vcombine.low %v4248_v22, %v4256_v25  ;;  %v4289_v57 = vcombine.low %v4264_v26, %v4272_v29  ;;  %v4274_v56 = vcombine.high %v4248_v22, %v4256_v25  ;;  %v4290_v5 = vcombine.high %v4264_v26, %v4272_v29  ;;  %v8216_v36 = vpop.eup %7143 }
0x106a   :  { %v5042_v47 = vsel %vm1877_vm4, %v8206_v17, 0.0  ;;  %v5048_v34 = vsel %vm1877_vm4, %v8216_v36, 0.0  ;;  %v8222_v37 = vpop.eup %7145 }
0x106b   :  { %v4281_v61 = vrot.slane %v4273_v13, %v7433_v31  ;;  %v4297_v45 = vrot.slane %v4289_v57, %v7433_v31  ;;  %v4288_v32 = vrot.slane %v4274_v56, %v7433_v31  ;;  %v4304_v62 = vrot.slane %v4290_v5, %v7433_v31 }
0x106c   :  { %5040 = vadd.xlane.f32.xlu1 %v5039_v14  ;;  %v5054_v50 = vsel %vm1877_vm4, %v8222_v37, 0.0 }
0x106d   :  { %5043 = vadd.xlane.f32.xlu0 %v5042_v47  ;;  %v4305_v27 = vcombine.low %v4281_v61, %v4297_v45  ;;  %v4306_v28 = vcombine.high %v4281_v61, %v4297_v45  ;;  %v4307_v9 = vcombine.low %v4288_v32, %v4304_v62  ;;  %v4308_v6 = vcombine.high %v4288_v32, %v4304_v62 }
0x106f   :  { %6891 = vmatpush3.msra.mxu0 %v4305_v27  ;;  %6896 = vmatpush3.msra.mxu1 %v4306_v28 }
0x1070   :  { %6900 = vmatprep.subr.mxu0 %v7220_v8  ;;  %6905 = vmatprep.subr.mxu1 %v7220_v8 }
0x1071   :  { %5049 = vadd.xlane.f32.xlu0 %v5048_v34 }
0x1075   :  { %5055 = vadd.xlane.f32.xlu0 %v5054_v50 }
0x107d   :  { %4095 = vrot.lane.b32.xlu1 %v7983_v23, %s7218_s28 }
0x1081   :  { %4101 = vrot.lane.b32.xlu1 %v7983_v23, %s7219_s29 }
0x108b   :  { %4089 = vrot.lane.b32.xlu0 %v7983_v23, %s7217_s27 }
0x10e9   :  { %v5047_v40 = vpop.xlane.xlu1 %5046 }
0x10ed   :  { %v5035_v38 = vpop.xlane.xlu1 %5034 }
0x10ee   :  { %7147 = vrcp.f32 %v5035_v38 }
0x10f1   :  { %v5053_v55 = vpop.xlane.xlu1 %5052 }
0x10f2   :  { %v5038_v42 = vpop.xlane.xlu0 %5037 }
0x10f3   :  { %7149 = vrcp.f32 %v5038_v42 }
0x10f5   :  { %v5041_v7 = vpop.xlane.xlu1 %5040 }
0x10f6   :  { %v5044_v44 = vpop.xlane.xlu0 %5043  ;;  %7151 = vrcp.f32 %v5041_v7 }
0x10f7   :  { %7153 = vrcp.f32 %v5044_v44 }
0x10f8   :  { %7155 = vrcp.f32 %v5047_v40 }
0x10f9   :  { %v4096_v16 = vpop.permute.xlu1 %4095 }
0x10fa   :  { %v5050_v18 = vpop.xlane.xlu0 %5049  ;;  %v4173_v19 = vcombine.low %v7983_v23, %v4096_v16  ;;  %v4174_v52 = vcombine.high %v7983_v23, %v4096_v16 }
0x10fb   :  { %v7148_v46 = vpop.eup %7147  ;;  %7157 = vrcp.f32 %v5050_v18 }
0x10fc   :  { %v5058_v33 = vmul.f32 %v7148_v46, %v8182_v48  ;;  %v4181_v2 = vrot.slane %v4173_v19, %v7430_v24  ;;  %v4188_v23 = vrot.slane %v4174_v52, %v7430_v24  ;;  %7159 = vrcp.f32 %v5053_v55 }
0x10fd   :  { %v4102_v58 = vpop.permute.xlu1 %4101 }
0x10fe   :  { %v5056_v49 = vpop.xlane.xlu0 %5055  ;;  %6893 = vmatmul.mubr.msk.f32.vlgmr.msra.gmra.mxu0 %vm1877_vm4, %v5058_v33 }
0x10ff   :  { %6901 = vmatpush3.msra.mxu0 %v4307_v9  ;;  %6902 = vmatprep.mubr.msk.f32.mxu0 %vm7221_vm1, %v7220_v8  ;;  %7161 = vrcp.f32 %v5056_v49 }
0x1100   :  { %v7150_v51 = vpop.eup %7149  ;;  %6910 = vmatprep.subr.mxu0 %v7220_v8 }
0x1101   :  { %v5060_v53 = vmul.f32 %v7150_v51, %v7138_v15 }
0x1102   :  { %v4090_v54 = vpop.permute.xlu0 %4089 }
0x1103   :  { %v7152_v60 = vpop.eup %7151  ;;  %v4189_v48 = vcombine.low %v4090_v54, %v4102_v58  ;;  %v4190_v59 = vcombine.high %v4090_v54, %v4102_v58  ;;  %6898 = vmatmul.mubr.msk.f32.vlgmr.msra.gmra.mxu1 %vm1877_vm4, %v5060_v53 }
0x1104   :  { %v7154_v0 = vpop.eup %7153  ;;  %6906 = vmatpush3.msra.mxu1 %v4308_v6  ;;  %6907 = vmatprep.mubr.msk.f32.mxu1 %vm7221_vm1, %v7220_v8  ;;  %v5062_v1 = vmul.f32 %v7152_v60, %v8199_v21 }
0x1105   :  { %v4197_v3 = vrot.slane %v4189_v48, %v7430_v24  ;;  %v4204_v30 = vrot.slane %v4190_v59, %v7430_v24  ;;  %v5064_v4 = vmul.f32 %v7154_v0, %v8206_v17  ;;  %6915 = vmatprep.subr.mxu1 %v7220_v8  ;;  %v7156_v47 = vpop.eup %7155 }
0x1106   :  { %6903 = vmatmul.mubr.msk.f32.vlgmr.msra.gmra.mxu0 %vm1877_vm4, %v5062_v1  ;;  %v5066_v55 = vmul.f32 %v7156_v47, %v8179_v39 }
0x1107   :  { %v4205_v35 = vcombine.low %v4181_v2, %v4197_v3  ;;  %v4206_v10 = vcombine.high %v4181_v2, %v4197_v3  ;;  %v4221_v15 = vcombine.low %v4188_v23, %v4204_v30  ;;  %v4222_v20 = vcombine.high %v4188_v23, %v4204_v30  ;;  %6908 = vmatmul.mubr.msk.f32.vlgmr.msra.gmra.mxu1 %vm1877_vm4, %v5064_v4 }
0x1108   :  { %6912 = vmatprep.mubr.msk.f32.mxu0 %vm7221_vm1, %v7220_v8  ;;  %6917 = vmatprep.mubr.msk.f32.mxu1 %vm7221_vm1, %v7220_v8  ;;  %v7158_v27 = vpop.eup %7157 }
0x1109   :  { %v4213_v21 = vrot.slane %v4205_v35, %v7433_v31  ;;  %v4220_v22 = vrot.slane %v4206_v10, %v7433_v31  ;;  %v4229_v25 = vrot.slane %v4221_v15, %v7433_v31  ;;  %v4236_v26 = vrot.slane %v4222_v20, %v7433_v31  ;;  %v7160_v50 = vpop.eup %7159 }
0x110a   :  { %v5068_v42 = vmul.f32 %v7158_v27, %v8216_v36  ;;  %v5070_v46 = vmul.f32 %v7160_v50, %v8191_v63  ;;  %v7055_v63 = vld [vmem:[%s8443_s2 + $0x38] sm:$0xff]   ;;  %v7056_v36 = vld [vmem:[%s8443_s2 + $0x30] sm:$0xff]  }
0x110b   :  { %v4309_v29 = vcombine.low %v4213_v21, %v4220_v22  ;;  %v6441_v12 = vcombine.high %v4213_v21, %v4220_v22  ;;  %v4325_v17 = vcombine.low %v4229_v25, %v4236_v26  ;;  %v6442_v13 = vcombine.high %v4229_v25, %v4236_v26 }
0x110c   :  { %v7162_v7 = vpop.eup %7161 }
0x110d   :  { %v4316_v57 = vrot.slane %v4309_v29, %v7430_v24  ;;  %v4324_v56 = vrot.slane %v6441_v12, %v7430_v24  ;;  %v4332_v5 = vrot.slane %v4325_v17, %v7430_v24  ;;  %v4340_v14 = vrot.slane %v6442_v13, %v7430_v24 }
0x110e   :  { %v5072_v39 = vmul.f32 %v7162_v7, %v8222_v37 }
0x110f   :  { %v4341_v61 = vcombine.low %v4316_v57, %v4324_v56  ;;  %v4357_v45 = vcombine.low %v4332_v5, %v4340_v14  ;;  %v4342_v32 = vcombine.high %v4316_v57, %v4324_v56  ;;  %v4358_v62 = vcombine.high %v4332_v5, %v4340_v14 }
0x1111   :  { %v4349_v28 = vrot.slane %v4341_v61, %v7433_v31  ;;  %v4365_v9 = vrot.slane %v4357_v45, %v7433_v31  ;;  %v4356_v6 = vrot.slane %v4342_v32, %v7433_v31  ;;  %v4372_v34 = vrot.slane %v4358_v62, %v7433_v31 }
0x1113   :  { %v4373_v40 = vcombine.low %v4349_v28, %v4365_v9  ;;  %v4374_v38 = vcombine.high %v4349_v28, %v4365_v9  ;;  %v4375_v44 = vcombine.low %v4356_v6, %v4372_v34  ;;  %v4376_v18 = vcombine.high %v4356_v6, %v4372_v34 }
0x1115   :  { %6911 = vmatpush3.msra.mxu0 %v4373_v40  ;;  %6916 = vmatpush3.msra.mxu1 %v4374_v38 }
0x1116   :  { %6913 = vmatmul.mubr.msk.f32.vlgmr.msra.gmra.mxu0 %vm1877_vm4, %v5066_v55  ;;  %6918 = vmatmul.mubr.msk.f32.vlgmr.msra.gmra.mxu1 %vm1877_vm4, %v5068_v42 }
0x1117   :  { %6920 = vmatprep.subr.mxu0 %v7220_v8  ;;  %6925 = vmatprep.subr.mxu1 %v7220_v8 }
0x1118   :  { %6921 = vmatpush3.msra.mxu0 %v4375_v44  ;;  %6926 = vmatpush3.msra.mxu1 %v4376_v18 }
0x1119   :  { %6922 = vmatprep.mubr.msk.f32.mxu0 %vm7221_vm1, %v7220_v8  ;;  %6927 = vmatprep.mubr.msk.f32.mxu1 %vm7221_vm1, %v7220_v8 }
0x111a   :  { %6923 = vmatmul.mubr.msk.f32.vlgmr.msra.gmra.mxu0 %vm1877_vm4, %v5070_v46  ;;  %6928 = vmatmul.mubr.msk.f32.vlgmr.msra.gmra.mxu1 %vm1877_vm4, %v5072_v39 }
0x111b   :  { %6930 = vmatprep.subr.bf16.mxu0 %v7220_v8  ;;  %6938 = vmatprep.mubr.msk.bf16.mxu0 %vm7221_vm1, %v7220_v8 }
0x111c   :  { %6150 = vmatprep.mubr.bf16.mxu1 %v7215_v11  ;;  %6931 = vmatpush3.bf16.msra.mxu0 %v7055_v63 }
0x111d   :  { %6932 = vmatprep.subr.bf16.mxu0 %v7220_v8 }
0x1120   :  { %6933 = vmatpush3.bf16.msra.mxu0 %v7056_v36 }
0x1121   :  { %6934 = vmatprep.subr.bf16.mxu0 %v7220_v8 }
0x11be   :  { %v5142_v37 = vpop.f32.mrf.mxu0 }
0x11c0   :  { %v6894_v16 = vpop.f32.mrf.mxu0 }
0x11c3   :  { %v5215_v33 = vpop.f32.mrf.mxu1 }
0x11c5   :  { %v6899_v49 = vpop.f32.mrf.mxu1 }
0x11c6   :  { %v5288_v51 = vpop.f32.mrf.mxu0 }
0x11c7   :  { %v5657_v11 = vcombine.low %v5142_v37, %v5288_v51  ;;  %v5658_v19 = vcombine.high %v5142_v37, %v5288_v51  ;;  %v5361_v52 = vpop.f32.mrf.mxu1 }
0x11c8   :  { %v5673_v53 = vcombine.low %v5215_v33, %v5361_v52  ;;  %v5674_v58 = vcombine.high %v5215_v33, %v5361_v52  ;;  %v6904_v54 = vpop.f32.mrf.mxu0 }
0x11c9   :  { %v5665_v60 = vrot.slane %v5657_v11, %v7430_v24  ;;  %v5672_v48 = vrot.slane %v5658_v19, %v7430_v24  ;;  %v6909_v59 = vpop.f32.mrf.mxu1 }
0x11ca   :  { %v5681_v0 = vrot.slane %v5673_v53, %v7430_v24  ;;  %v5688_v2 = vrot.slane %v5674_v58, %v7430_v24  ;;  %v7057_v53 = vld [vmem:[%s8443_s2 + $0x28] sm:$0xff]  }
0x11cb   :  { %6935 = vmatpush3.bf16.msra.mxu0 %v7057_v53 }
0x11cc   :  { %v5689_v1 = vcombine.low %v5665_v60, %v5681_v0  ;;  %v5690_v23 = vcombine.high %v5665_v60, %v5681_v0  ;;  %v5705_v3 = vcombine.low %v5672_v48, %v5688_v2  ;;  %v5706_v30 = vcombine.high %v5672_v48, %v5688_v2  ;;  %6936 = vmatprep.subr.bf16.mxu0 %v7220_v8 }
0x11ce   :  { %v5697_v4 = vrot.slane %v5689_v1, %v7433_v31  ;;  %v5704_v35 = vrot.slane %v5690_v23, %v7433_v31  ;;  %v5713_v10 = vrot.slane %v5705_v3, %v7433_v31  ;;  %v5720_v15 = vrot.slane %v5706_v30, %v7433_v31 }
0x11d0   :  { %v5793_v20 = vcombine.low %v5697_v4, %v5704_v35  ;;  %v6467_v21 = vcombine.high %v5697_v4, %v5704_v35  ;;  %v5809_v22 = vcombine.low %v5713_v10, %v5720_v15  ;;  %v6468_v25 = vcombine.high %v5713_v10, %v5720_v15 }
0x11d2   :  { %v5800_v26 = vrot.slane %v5793_v20, %v7430_v24  ;;  %v5808_v29 = vrot.slane %v6467_v21, %v7430_v24  ;;  %v5816_v12 = vrot.slane %v5809_v22, %v7430_v24  ;;  %v5824_v17 = vrot.slane %v6468_v25, %v7430_v24 }
0x11d4   :  { %v5825_v13 = vcombine.low %v5800_v26, %v5808_v29  ;;  %v5841_v57 = vcombine.low %v5816_v12, %v5824_v17  ;;  %v5826_v33 = vcombine.high %v5800_v26, %v5808_v29  ;;  %v5842_v49 = vcombine.high %v5816_v12, %v5824_v17 }
0x11d6   :  { %v5434_v56 = vpop.f32.mrf.mxu0  ;;  %v5507_v5 = vpop.f32.mrf.mxu1  ;;  %v8306_v14 = vrot.slane %v5825_v13, %v7433_v31  ;;  %v8309_v61 = vrot.slane %v5841_v57, %v7433_v31  ;;  %v5840_v59 = vrot.slane %v5826_v33, %v7433_v31  ;;  %v5856_v0 = vrot.slane %v5842_v49, %v7433_v31  ;;  %v7065_v33 = vld [vmem:[%s8444_s3 + $0x50] ss:$8 sps:$4 sm:$0xff]   ;;  %v7070_v49 = vld [vmem:[%s8444_s3 + $0x44] ss:$8 sps:$4 sm:$0xff]  }
0x11d8   :  { %v6914_v45 = vpop.f32.mrf.mxu0  ;;  %v6919_v32 = vpop.f32.mrf.mxu1  ;;  %v5857_v62 = vcombine.low %v8306_v14, %v8309_v61  ;;  %v5859_v15 = vcombine.low %v5840_v59, %v5856_v0  ;;  %v5858_v21 = vcombine.high %v8306_v14, %v8309_v61 }
0x11da   :  { %v5580_v47 = vpop.f32.mrf.mxu0  ;;  %v5653_v27 = vpop.f32.mrf.mxu1 }
0x11db   :  { %v5725_v28 = vcombine.low %v5434_v56, %v5580_v47  ;;  %v5726_v9 = vcombine.high %v5434_v56, %v5580_v47  ;;  %v5741_v6 = vcombine.low %v5507_v5, %v5653_v27  ;;  %v5742_v34 = vcombine.high %v5507_v5, %v5653_v27 }
0x11dc   :  { %v6924_v50 = vpop.f32.mrf.mxu0  ;;  %v6929_v40 = vpop.f32.mrf.mxu1 }
0x11dd   :  { %v5733_v38 = vrot.slane %v5725_v28, %v7430_v24  ;;  %v5740_v55 = vrot.slane %v5726_v9, %v7430_v24  ;;  %v5749_v42 = vrot.slane %v5741_v6, %v7430_v24  ;;  %v5756_v7 = vrot.slane %v5742_v34, %v7430_v24 }
0x11df   :  { %v5757_v44 = vcombine.low %v5733_v38, %v5749_v42  ;;  %v5758_v18 = vcombine.high %v5733_v38, %v5749_v42  ;;  %v5773_v46 = vcombine.low %v5740_v55, %v5756_v7  ;;  %v5774_v39 = vcombine.high %v5740_v55, %v5756_v7 }
0x11e1   :  { %v5765_v63 = vrot.slane %v5757_v44, %v7433_v31  ;;  %v5772_v36 = vrot.slane %v5758_v18, %v7433_v31  ;;  %v5781_v37 = vrot.slane %v5773_v46, %v7433_v31  ;;  %v5788_v16 = vrot.slane %v5774_v39, %v7433_v31 }
0x11e3   :  { %v5861_v51 = vcombine.low %v5765_v63, %v5772_v36  ;;  %v6469_v11 = vcombine.high %v5765_v63, %v5772_v36  ;;  %v5877_v19 = vcombine.low %v5781_v37, %v5788_v16  ;;  %v6470_v52 = vcombine.high %v5781_v37, %v5788_v16  ;;  %v7061_v36 = vld [vmem:[%s8444_s3 + $0x74] ss:$8 sps:$4 sm:$0xff]   ;;  %v7062_v37 = vld [vmem:[%s8444_s3 + $0x60] ss:$8 sps:$4 sm:$0xff]  }
0x11e4   :  { %6126 = vmatprep.subr.bf16.mxu1 %v7061_v36  ;;  %v7067_v16 = vld [vmem:[%s8444_s3 + $0x54] ss:$8 sps:$4 sm:$0xff]  }
0x11e5   :  { %v5868_v58 = vrot.slane %v5861_v51, %v7430_v24  ;;  %v5876_v54 = vrot.slane %v6469_v11, %v7430_v24  ;;  %v5884_v60 = vrot.slane %v5877_v19, %v7430_v24  ;;  %v5892_v48 = vrot.slane %v6470_v52, %v7430_v24  ;;  %v7058_v24 = vld [vmem:[%s8443_s2 + $0x20] sm:$0xff]  }
0x11e6   :  { %6937 = vmatpush3.bf16.msra.mxu0 %v7058_v24  ;;  %v7068_v51 = vld [vmem:[%s8444_s3 + $0x40] ss:$8 sps:$4 sm:$0xff]   ;;  %v7075_v24 = vld [vmem:[%s8445_s4 + $0x58] sm:$0xff]  }
0x11e7   :  { %v5894_v2 = vcombine.high %v5868_v58, %v5876_v54  ;;  %v5910_v1 = vcombine.high %v5884_v60, %v5892_v48  ;;  %v5893_v23 = vcombine.low %v5868_v58, %v5876_v54  ;;  %v5909_v3 = vcombine.low %v5884_v60, %v5892_v48  ;;  %6942 = vmatprep.subr.bf16.mxu0 %v7220_v8 }
0x11e9   :  { %v5908_v30 = vrot.slane %v5894_v2, %v7433_v31  ;;  %v5924_v4 = vrot.slane %v5910_v1, %v7433_v31  ;;  %v5901_v35 = vrot.slane %v5893_v23, %v7433_v31  ;;  %v5917_v10 = vrot.slane %v5909_v3, %v7433_v31 }
0x11ea   :  { %v5860_v31 = vcombine.high %v5840_v59, %v5856_v0  ;;  %v6485_v0 = vld [vmem:[%s8447_s6 + $0x1] ss:$0 sm:$0xff] }
0x11eb   :  { %v5927_v20 = vcombine.low %v5908_v30, %v5924_v4  ;;  %v5926_v22 = vcombine.high %v5901_v35, %v5917_v10  ;;  %v5925_v25 = vcombine.low %v5901_v35, %v5917_v10  ;;  %v5928_v12 = vcombine.high %v5908_v30, %v5924_v4  ;;  %v7071_v30 = vld [vmem:[%s8445_s4 + $0x78] sm:$0xff]   ;;  %v7072_v4 = vld [vmem:[%s8445_s4 + $0x70] sm:$0xff]   ;;  %v7073_v35 = vld [vmem:[%s8445_s4 + $0x68] sm:$0xff]  }
0x11ec   :  { %v7074_v10 = vld [vmem:[%s8445_s4 + $0x60] sm:$0xff]  }
0x11ed   :  { %v6997_v26 = vpack.i.bf16 %v5927_v20, %v5859_v15  ;;  %v6992_v29 = vpack.i.bf16 %v5926_v22, %v5858_v21  ;;  %v7002_v17 = vpack.i.bf16 %v5928_v12, %v5860_v31  ;;  %v7076_v15 = vld [vmem:[%s8445_s4 + $0x50] sm:$0xff]   ;;  %v7077_v20 = vld [vmem:[%s8445_s4 + $0x48] sm:$0xff]   ;;  %v7078_v21 = vld [vmem:[%s8445_s4 + $0x40] sm:$0xff]  }
0x11ef   :  { %6998 = vrot.lane.b32.xlu1 %v6997_v26, %s7224_s19  ;;  %6993 = vrot.lane.b32.xlu0 %v6992_v29, %s7225_s20 }
0x11f3   :  { %7003 = vrot.lane.b32.xlu0 %v7002_v17, %s7226_s21 }
0x1261   :  { %v6999_v13 = vpop.permute.xlu1 %6998  ;;  %v6994_v57 = vpop.permute.xlu0 %6993 }
0x1262   :  { %v6996_v56 = vunpack.i.h.bf16 %v6994_v57  ;;  %v6995_v5 = vunpack.i.l.bf16 %v6994_v57  ;;  %v7001_v45 = vunpack.i.h.bf16 %v6999_v13  ;;  %v7000_v32 = vunpack.i.l.bf16 %v6999_v13 }
0x1264   :  { %v5953_v47 = vsel %vm1268_vm3, %v5857_v62, %v6995_v5  ;;  %v5954_v27 = vsel %vm1268_vm3, %v5925_v25, %v6996_v56 }
0x1265   :  { %v7004_v28 = vpop.permute.xlu0 %7003  ;;  %v5955_v34 = vsel %vm2848_vm5, %v5953_v47, %v7000_v32  ;;  %v5956_v50 = vsel %vm2848_vm5, %v5954_v27, %v7001_v45 }
0x1266   :  { %v7006_v9 = vunpack.i.h.bf16 %v7004_v28  ;;  %v7005_v6 = vunpack.i.l.bf16 %v7004_v28 }
0x1268   :  { %v5957_v40 = vsel %vm2851_vm6, %v5955_v34, %v7005_v6  ;;  %v5958_v38 = vsel %vm2851_vm6, %v5956_v50, %v7006_v9 }
0x1269   :  { %v5959_v55 = vpack.c.bf16 %v5958_v38, %v5957_v40 }
0x126b   :  { %6939 = vmatmul.mubr.msk.bf16.vlgmr.msra.gmra.mxu0 %vm63_vm0, %v5959_v55 }
0x126c   :  { %6958 = vmatprep.mubr.msk.bf16.mxu0 %vm7221_vm1, %v7220_v8  ;;  %6943 = vmatpush3.bf16.msra.mxu0 %v7071_v30 }
0x126d   :  { %6944 = vmatprep.subr.bf16.mxu0 %v7220_v8 }
0x1270   :  { %6945 = vmatpush3.bf16.msra.mxu0 %v7072_v4 }
0x1271   :  { %6946 = vmatprep.subr.bf16.mxu0 %v7220_v8 }
0x1274   :  { %6947 = vmatpush3.bf16.msra.mxu0 %v7073_v35 }
0x1275   :  { %6948 = vmatprep.subr.bf16.mxu0 %v7220_v8 }
0x1278   :  { %6949 = vmatpush3.bf16.msra.mxu0 %v7074_v10 }
0x1279   :  { %6950 = vmatprep.subr.bf16.mxu0 %v7220_v8 }
0x127c   :  { %6951 = vmatpush3.bf16.msra.mxu0 %v7075_v24 }
0x127d   :  { %6952 = vmatprep.subr.bf16.mxu0 %v7220_v8 }
0x1280   :  { %6953 = vmatpush3.bf16.msra.mxu0 %v7076_v15 }
0x1281   :  { %6954 = vmatprep.subr.bf16.mxu0 %v7220_v8 }
0x1284   :  { %6955 = vmatpush3.bf16.msra.mxu0 %v7077_v20 }
0x1285   :  { %6956 = vmatprep.subr.bf16.mxu0 %v7220_v8 }
0x1288   :  { %6957 = vmatpush3.bf16.msra.mxu0 %v7078_v21 }
0x132b   :  { %v6030_v14 = vpop.f32.mrf.mxu0 }
0x132c   :  { %v8357_v61 = vadd.f32 %v6030_v14, %v7913_v41  ;;  %v7059_v41 = vld [vmem:[%s8444_s3 + $0x70] ss:$8 sps:$4 sm:$0xff]  }
0x132d   :  { %v6940_v62 = vpop.f32.mrf.mxu0  ;;  %6127 = vmatpush1.bf16.msra.mxu1 %v7059_v41 }
0x132e   :  { %v6041_v42 = vmul.f32 %v8357_v61, %v8357_v61 }
0x132f   :  { %v6033_v7 = vpop.f32.mrf.mxu0 }
0x1330   :  { %v8362_v44 = vadd.f32 %v6033_v7, %v7918_v43  ;;  %v6043_v18 = vsel %vm63_vm0, %v6041_v42, 0.0  ;;  %v7064_v43 = vld [vmem:[%s8444_s3 + $0x64] ss:$8 sps:$4 sm:$0xff]  }
0x1331   :  { %6044 = vadd.xlane.f32.xlu1 %v6043_v18  ;;  %v6941_v46 = vpop.f32.mrf.mxu0  ;;  %6128 = vmatprep.subr.bf16.mxu1 %v7064_v43 }
0x1332   :  { %v6042_v39 = vmul.f32 %v8362_v44, %v8362_v44  ;;  %6129 = vmatpush1.bf16.msra.mxu1 %v7062_v37 }
0x1333   :  { %6130 = vmatprep.subr.bf16.mxu1 %v7067_v16 }
0x1334   :  { %v6046_v63 = vsel %vm63_vm0, %v6042_v39, 0.0 }
0x1335   :  { %6047 = vadd.xlane.f32.xlu0 %v6046_v63 }
0x1336   :  { %6131 = vmatpush1.bf16.msra.mxu1 %v7065_v33 }
0x1337   :  { %6132 = vmatprep.subr.bf16.mxu1 %v7070_v49 }
0x133a   :  { %6133 = vmatpush1.bf16.msra.mxu1 %v7068_v51 }
0x13ba   :  { %v6045_v11 = vpop.xlane.xlu1 %6044 }
0x13bb   :  { %v6049_v19 = vmul.f32 0.015625, %v6045_v11 }
0x13bd   :  { %v6051_v52 = vadd.f32 1e-06, %v6049_v19 }
0x13be   :  { %v6048_v53 = vpop.xlane.xlu0 %6047 }
0x13bf   :  { %7163 = vrsqrt.f32 %v6051_v52  ;;  %v6050_v58 = vmul.f32 0.015625, %v6048_v53 }
0x13c1   :  { %v6052_v54 = vadd.f32 1e-06, %v6050_v58 }
0x13c3   :  { %7165 = vrsqrt.f32 %v6052_v54 }
0x13cc   :  { %v7164_v60 = vpop.eup %7163 }
0x13cd   :  { %v6055_v48 = vmul.f32 %v7164_v60, %v8357_v61 }
0x13cf   :  { %v6063_v1 = vmul.f32 %v6485_v0, %v6055_v48 }
0x13d0   :  { %v7166_v59 = vpop.eup %7165 }
0x13d1   :  { %v6056_v2 = vmul.f32 %v7166_v59, %v8362_v44 }
0x13d3   :  { %v6064_v23 = vmul.f32 %v6485_v0, %v6056_v2 }
0x13d5   :  { %v6065_v3 = vpack.c.bf16 %v6064_v23, %v6063_v1 }
0x13d7   :  { %6502 = vmatmul.mubr.msk.bf16.vlgmr.msra.gmra.mxu1 %vm63_vm0, %v6065_v3 }
0x1497   :  { %v6152_v22 = vpop.f32.mrf.mxu1 }
0x1498   :  { %v6503_v25 = vmul.f32 -1.442695, %v6152_v22 }
0x1499   :  { %v6154_v26 = vpop.f32.mrf.mxu1 }
0x149a   :  { %7167 = vpow2.f32 %v6503_v25 }
0x149b   :  { %v6156_v29 = vpop.f32.mrf.mxu1 }
0x149c   :  { %v6504_v12 = vmul.f32 -1.442695, %v6156_v29 }
0x149d   :  { %v6158_v47 = vpop.f32.mrf.mxu1 }
0x149e   :  { %7169 = vpow2.f32 %v6504_v12 }
0x14a7   :  { %v7168_v31 = vpop.eup %7167 }
0x14a8   :  { %v6167_v17 = vadd.f32 1.0, %v7168_v31 }
0x14aa   :  { %7171 = vrcp.f32 %v6167_v17 }
0x14ab   :  { %v7170_v13 = vpop.eup %7169 }
0x14ac   :  { %v6168_v57 = vadd.f32 1.0, %v7170_v13 }
0x14ae   :  { %7173 = vrcp.f32 %v6168_v57 }
0x14b7   :  { %v7172_v56 = vpop.eup %7171 }
0x14b8   :  { %v6173_v5 = vmul.f32 %v7172_v56, %v6152_v22 }
0x14ba   :  { %v6175_v8 = vmul.f32 %v6173_v5, %v6154_v26 }
0x14bb   :  { %v7174_v45 = vpop.eup %7173 }
0x14bc   :  { %v6174_v32 = vmul.f32 %v7174_v45, %v6156_v29 }
0x14be   :  { %v6176_v27 = vmul.f32 %v6174_v32, %v6158_v47 }
0x14c0   :  { %v6177_v28 = vpack.c.bf16 %v6176_v27, %v6175_v8 }
0x14c2   :  { %6959 = vmatmul.mubr.bf16.vlgmr.msra.gmra.mxu0 %v6177_v28 }
0x1582   :  { %v6277_v9 = vpop.f32.mrf.mxu0 }
0x1583   :  { %v6284_v6 = vadd.f32 %v6277_v9, %v8357_v61 }
0x1584   :  { %v6960_v34 = vpop.f32.mrf.mxu0 }
0x1585   :  { %v6287_v50 = vmul.f32 %v6284_v6, %v6284_v6 }
0x1586   :  { %v6280_v40 = vpop.f32.mrf.mxu0 }
0x1587   :  { %v6285_v38 = vadd.f32 %v6280_v40, %v8362_v44  ;;  %v6289_v55 = vsel %vm63_vm0, %v6287_v50, 0.0  ;;  %v6529_v44 = vld [vmem:[%s8448_s7] ss:$0 sm:$0xff] }
0x1588   :  { %6290 = vadd.xlane.f32.xlu0 %v6289_v55  ;;  %v6961_v14 = vpop.f32.mrf.mxu0 }
0x1589   :  { %v6288_v62 = vmul.f32 %v6285_v38, %v6285_v38 }
0x158b   :  { %v6292_v42 = vsel %vm63_vm0, %v6288_v62, 0.0 }
0x158c   :  { %6293 = vadd.xlane.f32.xlu1 %v6292_v42 }
0x1611   :  { %v6291_v7 = vpop.xlane.xlu0 %6290 }
0x1612   :  { %v6295_v18 = vmul.f32 0.015625, %v6291_v7 }
0x1614   :  { %v6297_v46 = vadd.f32 1e-06, %v6295_v18 }
0x1615   :  { %v6294_v39 = vpop.xlane.xlu1 %6293 }
0x1616   :  { %7175 = vrsqrt.f32 %v6297_v46  ;;  %v6296_v63 = vmul.f32 0.015625, %v6294_v39 }
0x1618   :  { %v6298_v61 = vadd.f32 1e-06, %v6296_v63 }
0x161a   :  { %7177 = vrsqrt.f32 %v6298_v61 }
0x1623   :  { %v7176_v41 = vpop.eup %7175 }
0x1624   :  { %v6301_v36 = vmul.f32 %v7176_v41, %v6284_v6 }
0x1626   :  { %v6309_v43 = vmul.f32 %v6529_v44, %v6301_v36 }
0x1627   :  { %v7178_v37 = vpop.eup %7177 }
0x1628   :  { %v6302_v16 = vmul.f32 %v7178_v37, %v6285_v38  ;;  %6311 = vst.msk [vmem:[#allocation2] sm:$0xff] %vm63_vm0, %v6309_v43 }
0x162a   :  { %v6310_v33 = vmul.f32 %v6529_v44, %v6302_v16 }
0x162c   :  { %6312 = vst.msk [vmem:[#allocation2 + $0x8] sm:$0xff] %vm63_vm0, %v6310_v33 }
0x162d   :  { %7204 = shalt.err (!%p7201_p4)
}
0x162e   :  { %s7228_s7 = smov 128   ;;  %s7229_s1 = smov 8  }
0x162f   :  { %6324 = dma.vmem_to_hbm [thread:$0]  %s6319_s26, 256, %s8452_s11, [#allocation3], %s7228_s7, %s7228_s7, %s7229_s1  }
0x1630   :  { %7213 = dma.done.wait [#allocation3], 256  }
0x1631   :  { %7214 = vsyncadd [#allocation3], 4294967040 }
0x1632   :  { %6328 = vsyncpa [#allocation3], 1 }

</bundles_post_ra>
